<compile_context>
chip_gen: v7x
topology: tpu7x:2x2x1
jax: 0.10.0
libtpu: 0.0.40
codegen_flags: <defaults>
</compile_context>

<pallas_src>
import jax
import jax.numpy as jnp
from jax import lax
from jax.experimental import pallas as pl
from jax.experimental.pallas import tpu as pltpu


def pos_attn_kernel(x_ref, fb_ref, fc_ref, fd_ref, alpha_ref, out_ref):
    # x_ref:   (1, C,  TQ) f32   residual / query tile of x
    # fb_ref:  (1, C8, TQ) bf16  query projection tile
    # fc_ref:  (1, C8, HW) bf16  key projection (full, re-DMA'd only per batch)
    # fd_ref:  (1, C,  HW) bf16  value projection (full, re-DMA'd only per batch)
    # alpha_ref: (1,) f32 in SMEM
    # out_ref: (1, C, TQ) f32    lane-dense output tile
    fb = fb_ref[0]                                               # (C8, TQ)
    fc = fc_ref[0]                                               # (C8, HW)

    # energy[i, j] = <fb[:, i], fc[:, j]>  -> (TQ, HW), f32 accumulation on MXU.
    s = lax.dot_general(fb, fc,
                        dimension_numbers=(((0,), (0,)), ((), ())),
                        preferred_element_type=jnp.float32)      # (TQ, HW)

    # Numerically-stable softmax; reductions stay f32 (v5e-safe, EUP-bound anyway).
    m = jnp.max(s, axis=-1, keepdims=True)                       # (TQ, 1)
    p = jnp.exp(s - m)                                           # (TQ, HW)
    row_sum = jnp.sum(p, axis=-1, keepdims=True)                 # (TQ, 1)
    inv = pl.reciprocal(row_sum, approx=True)                    # EUP slot
    p_n = (p * inv).astype(jnp.bfloat16)                         # VPU, hidden under exp

    # feat_e[c, i] = sum_j fd[c, j] * attn[i, j]  -> (C, TQ), lane-dense.
    fe = lax.dot_general(fd_ref[0], p_n,
                         dimension_numbers=(((1,), (1,)), ((), ())),
                         preferred_element_type=jnp.float32)     # (C, TQ)

    out_ref[0] = alpha_ref[0] * fe + x_ref[0]


def _vmem_estimate(hw, c, c8, tq):
    """Rough bytes of VMEM used by one grid step (pipeline blocks + live tiles)."""
    f32, bf16 = 4, 2
    pipelined = 2 * (c * tq * f32        # x query tile (double-buffered)
                     + c * tq * f32      # out tile
                     + c8 * tq * bf16    # fb query tile
                     + c8 * hw * bf16    # fc (full keys)
                     + c * hw * bf16)    # fd (full values)
    live = (2 * tq * hw * f32            # s and p
            + tq * hw * bf16             # normalized bf16 p
            + c * tq * f32)              # fe
    return pipelined + live


def _choose_tq(hw, c, c8, budget):
    """Largest legal query tile (multiple of 128 dividing HW, or HW itself)
    whose 1.5x VMEM estimate fits within `budget`."""
    cands = []
    if hw <= 1024:
        cands.append(hw)                 # single tile: minimal grid overhead
    for t in range(512, 127, -128):
        if t < hw and hw % t == 0:
            cands.append(t)
    if not cands:
        # TODO(synk): HW not a multiple of 128 and large — would need masked tiles.
        cands = [hw]
    for t in sorted(set(cands), reverse=True):
        if 1.5 * _vmem_estimate(hw, c, c8, t) <= budget:
            return t
    return min(cands)


def position_attention(x_nchw, params, *, tq=None):
    """x_nchw: (B, C, H, W) float32. params: dict of weights (see init_params)."""
    B, C, H, W = x_nchw.shape
    HW = H * W
    C8 = params["wb"].shape[1]

    # Channels-first token layout (B, C, HW): no transpose needed, HW is lanes.
    x_cf = x_nchw.reshape(B, C, HW).astype(jnp.float32)

    # 1x1-conv projections are plain matmuls — leave them to XLA (negligible
    # next to the O(HW^2) attention) and hand the kernel bf16 MXU operands.
    def proj(w, b):
        y = jnp.einsum("ck,bcp->bkp", w, x_cf) + b.reshape(1, -1, 1)
        return y.astype(jnp.bfloat16)

    fb = proj(params["wb"], params["bb"])          # (B, C8, HW)
    fc = proj(params["wc"], params["bc"])          # (B, C8, HW)
    fd = proj(params["wd"], params["bd"])          # (B, C,  HW)

    alpha = params["alpha"].reshape(1).astype(jnp.float32)

    # VMEM budget: never request more than ~75% of physical per-core VMEM
    # (v7x has only 64 MiB); fall back to the v7x number if the query fails.
    try:
        vmem_cap = getattr(pltpu.get_tpu_info(), "vmem_capacity_bytes", 64 * 2**20)
    except Exception:
        vmem_cap = 64 * 2**20
    budget = int(0.75 * vmem_cap)

    if tq is None:
        tq = _choose_tq(HW, C, C8, budget)
    assert HW % tq == 0, f"tq={tq} must divide HW={HW}"
    nq = HW // tq

    est = _vmem_estimate(HW, C, C8, tq)
    vmem_limit = int(min(budget, max(16 * 2**20, 1.5 * est)))

    out_cf = pl.pallas_call(
        pos_attn_kernel,
        out_shape=jax.ShapeDtypeStruct((B, C, HW), jnp.float32),
        grid_spec=pltpu.PrefetchScalarGridSpec(
            num_scalar_prefetch=0,
            grid=(B, nq),
            in_specs=[
                pl.BlockSpec((1, C, tq), lambda b, q: (b, 0, q)),    # x (residual tile)
                pl.BlockSpec((1, C8, tq), lambda b, q: (b, 0, q)),   # fb (query tile)
                pl.BlockSpec((1, C8, HW), lambda b, q: (b, 0, 0)),   # fc (full keys)
                pl.BlockSpec((1, C, HW), lambda b, q: (b, 0, 0)),    # fd (full values)
                pl.BlockSpec(memory_space=pltpu.MemorySpace.SMEM),   # alpha scalar
            ],
            out_specs=pl.BlockSpec((1, C, tq), lambda b, q: (b, 0, q)),
        ),
        compiler_params=pltpu.CompilerParams(
            dimension_semantics=("parallel", "parallel"),
            vmem_limit_bytes=vmem_limit),
    )(x_cf, fb, fc, fd, alpha)

    return out_cf.reshape(B, C, H, W)


def init_params(key, in_channels):
    """Deterministic synthetic parameters (conv_b/c: C->C/8, conv_d: C->C, alpha: (1,))."""
    C = in_channels
    C8 = C // 8
    ks = jax.random.split(key, 7)
    scale = 0.1
    # Conv2d 1x1 weights stored as (Cin, Cout).
    wb = scale * jax.random.normal(ks[0], (C, C8), jnp.float32)
    bb = scale * jax.random.normal(ks[1], (1, C8), jnp.float32)
    wc = scale * jax.random.normal(ks[2], (C, C8), jnp.float32)
    bc = scale * jax.random.normal(ks[3], (1, C8), jnp.float32)
    wd = scale * jax.random.normal(ks[4], (C, C), jnp.float32)
    bd = scale * jax.random.normal(ks[5], (1, C), jnp.float32)
    # Module inits alpha = 0; use a nonzero value so the attention path is exercised.
    alpha = jnp.full((1,), 0.5, jnp.float32)
    return dict(wb=wb, bb=bb, wc=wc, bc=bc, wd=wd, bd=bd, alpha=alpha)


def position_attention_ref(x_nchw, params):
    """Pure-JAX f32 reference mirroring the PyTorch forward (NCHW semantics)."""
    B, C, H, W = x_nchw.shape
    HW = H * W
    x = x_nchw.reshape(B, C, HW)                                          # (B, C, HW)
    conv = lambda w, b: jnp.einsum("io,bip->bop", w, x) + b.reshape(1, -1, 1)
    feat_b = jnp.transpose(conv(params["wb"], params["bb"]), (0, 2, 1))   # (B, HW, C8)
    feat_c = conv(params["wc"], params["bc"])                              # (B, C8, HW)
    energy = jnp.einsum("bic,bcj->bij", feat_b, feat_c)                    # (B, HW, HW)
    attn = jax.nn.softmax(energy, axis=-1)
    feat_d = conv(params["wd"], params["bd"])                              # (B, C, HW)
    feat_e = jnp.einsum("bck,bjk->bcj", feat_d, attn).reshape(B, C, H, W)
    return params["alpha"][0] * feat_e + x_nchw


if __name__ == "__main__":
    key = jax.random.PRNGKey(0)
    k_x, k_p = jax.random.split(key)

    B, C, H, W = 2, 16, 16, 16        # in_channels=16 -> C//8 = 2; HW = 256
    x = jax.random.normal(k_x, (B, C, H, W), jnp.float32)
    params = init_params(k_p, C)

    ref = position_attention_ref(x, params)

    # Auto tile size: small feature map collapses to one query tile (grid=(B, 1)).
    out_auto = jax.block_until_ready(position_attention(x, params))
    # Forced tq=128: exercises the multi-tile query path and the fully parallel grid.
    out_tiled = jax.block_until_ready(position_attention(x, params, tq=128))

    # Tolerance covers bf16 MXU operands, deferred/approx softmax reciprocal;
    # everything else (reductions, accumulation, residual) is f32.
    for out in (out_auto, out_tiled):
        assert out.shape == (B, C, H, W)
        assert jnp.allclose(out, ref, atol=1.5e-2, rtol=1.5e-2), "mismatch vs reference"

    print("KERNEL_OK")
</pallas_src>

<mosaic_0001>
module attributes {stable_mosaic.version = 11 : i64} {
  func.func @pos_attn_kernel(%arg0: i32, %arg1: i32, %arg2: memref<1x16x256xf32, #tpu.memory_space<vmem>>, %arg3: memref<1x2x256xbf16, #tpu.memory_space<vmem>>, %arg4: memref<1x2x256xbf16, #tpu.memory_space<vmem>>, %arg5: memref<1x16x256xbf16, #tpu.memory_space<vmem>>, %arg6: memref<1xf32, #tpu.memory_space<smem>>, %arg7: memref<1x16x256xf32, #tpu.memory_space<vmem>>) attributes {dimension_semantics = [#tpu.dimension_semantics<parallel>, #tpu.dimension_semantics<parallel>], iteration_bounds = array<i64: 2, 1>, scalar_prefetch = 0 : i64, scratch_operands = 0 : i64, tpu.core_type = #tpu.core_type<tc>, window_params = [{transform_indices = @transform_0, window_bounds = array<i64: 1, 16, 256>}, {transform_indices = @transform_1, window_bounds = array<i64: 1, 2, 256>}, {transform_indices = @transform_2, window_bounds = array<i64: 1, 2, 256>}, {transform_indices = @transform_3, window_bounds = array<i64: 1, 16, 256>}, {transform_indices = @transform_4, window_bounds = array<i64: 1>}, {transform_indices = @transform_5, window_bounds = array<i64: 1, 16, 256>}]} {
    %c0 = arith.constant 0 : index
    %c0_0 = arith.constant 0 : index
    %c0_1 = arith.constant 0 : index
    %0 = vector.load %arg3[%c0, %c0_0, %c0_1] : memref<1x2x256xbf16, #tpu.memory_space<vmem>>, vector<1x2x256xbf16>
    %1 = vector.shape_cast %0 : vector<1x2x256xbf16> to vector<2x256xbf16>
    %c0_2 = arith.constant 0 : index
    %c0_3 = arith.constant 0 : index
    %c0_4 = arith.constant 0 : index
    %2 = vector.load %arg4[%c0_2, %c0_3, %c0_4] : memref<1x2x256xbf16, #tpu.memory_space<vmem>>, vector<1x2x256xbf16>
    %3 = vector.shape_cast %2 : vector<1x2x256xbf16> to vector<2x256xbf16>
    %cst = arith.constant dense<0.000000e+00> : vector<256x256xf32>
    %4 = tpu.matmul %1, %3, %cst {dimension_numbers = #tpu.dot_dimension_numbers<[0], [0], [1], [1], [0, 1, 1, 1], [], []>} : vector<2x256xbf16>, vector<2x256xbf16>, vector<256x256xf32> -> vector<256x256xf32>
    %cst_5 = arith.constant dense<0xFF800000> : vector<256xf32>
    %5 = vector.multi_reduction <maximumf>, %4, %cst_5 [1] : vector<256x256xf32> to vector<256xf32>
    %6 = vector.shape_cast %5 : vector<256xf32> to vector<256x1xf32>
    %7 = vector.broadcast %6 : vector<256x1xf32> to vector<256x256xf32>
    %8 = arith.subf %4, %7 : vector<256x256xf32>
    %9 = math.exp %8 : vector<256x256xf32>
    %cst_6 = arith.constant dense<0.000000e+00> : vector<256xf32>
    %10 = vector.multi_reduction <add>, %9, %cst_6 [1] : vector<256x256xf32> to vector<256xf32>
    %11 = vector.shape_cast %10 : vector<256xf32> to vector<256x1xf32>
    %12 = tpu.reciprocal %11 {approx = true} : vector<256x1xf32> -> vector<256x1xf32>
    %13 = vector.broadcast %12 : vector<256x1xf32> to vector<256x256xf32>
    %14 = arith.mulf %9, %13 : vector<256x256xf32>
    %15 = arith.truncf %14 : vector<256x256xf32> to vector<256x256xbf16>
    %c0_7 = arith.constant 0 : index
    %c0_8 = arith.constant 0 : index
    %c0_9 = arith.constant 0 : index
    %16 = vector.load %arg5[%c0_7, %c0_8, %c0_9] : memref<1x16x256xbf16, #tpu.memory_space<vmem>>, vector<1x16x256xbf16>
    %17 = vector.shape_cast %16 : vector<1x16x256xbf16> to vector<16x256xbf16>
    %cst_10 = arith.constant dense<0.000000e+00> : vector<16x256xf32>
    %18 = tpu.matmul %17, %15, %cst_10 {dimension_numbers = #tpu.dot_dimension_numbers<[1], [1], [0], [0], [0, 0, 1, 0], [], []>} : vector<16x256xbf16>, vector<256x256xbf16>, vector<16x256xf32> -> vector<16x256xf32>
    %c0_11 = arith.constant 0 : index
    %19 = memref.load %arg6[%c0_11] : memref<1xf32, #tpu.memory_space<smem>>
    %20 = vector.broadcast %19 : f32 to vector<16x256xf32>
    %21 = arith.mulf %20, %18 : vector<16x256xf32>
    %c0_12 = arith.constant 0 : index
    %c0_13 = arith.constant 0 : index
    %c0_14 = arith.constant 0 : index
    %22 = vector.load %arg2[%c0_12, %c0_13, %c0_14] : memref<1x16x256xf32, #tpu.memory_space<vmem>>, vector<1x16x256xf32>
    %23 = vector.shape_cast %22 : vector<1x16x256xf32> to vector<16x256xf32>
    %24 = arith.addf %21, %23 : vector<16x256xf32>
    %c0_15 = arith.constant 0 : index
    %c0_16 = arith.constant 0 : index
    %c0_17 = arith.constant 0 : index
    %25 = vector.load %arg7[%c0_15, %c0_16, %c0_17] : memref<1x16x256xf32, #tpu.memory_space<vmem>>, vector<1x16x256xf32>
    %26 = vector.shape_cast %25 : vector<1x16x256xf32> to vector<16x256xf32>
    %27 = vector.shape_cast %24 : vector<16x256xf32> to vector<1x16x256xf32>
    tpu.vector_store %arg7[%c0_15, %c0_16, %c0_17], %27 {strides = array<i32>} : memref<1x16x256xf32, #tpu.memory_space<vmem>>, vector<1x16x256xf32>,
    return
  }
  func.func @transform_0(%arg0: i32, %arg1: i32) -> (i32, i32, i32) {
    %c0_i32 = arith.constant 0 : i32
    %c0_i32_0 = arith.constant 0 : i32
    return %arg0, %c0_i32, %arg1 : i32, i32, i32
  }
  func.func @transform_1(%arg0: i32, %arg1: i32) -> (i32, i32, i32) {
    %c0_i32 = arith.constant 0 : i32
    %c0_i32_0 = arith.constant 0 : i32
    return %arg0, %c0_i32, %arg1 : i32, i32, i32
  }
  func.func @transform_2(%arg0: i32, %arg1: i32) -> (i32, i32, i32) {
    %c0_i32 = arith.constant 0 : i32
    %c0_i32_0 = arith.constant 0 : i32
    %c0_i32_1 = arith.constant 0 : i32
    return %arg0, %c0_i32, %c0_i32_0 : i32, i32, i32
  }
  func.func @transform_3(%arg0: i32, %arg1: i32) -> (i32, i32, i32) {
    %c0_i32 = arith.constant 0 : i32
    %c0_i32_0 = arith.constant 0 : i32
    %c0_i32_1 = arith.constant 0 : i32
    return %arg0, %c0_i32, %c0_i32_0 : i32, i32, i32
  }
  func.func @transform_4(%arg0: i32, %arg1: i32) -> i32 {
    %c0_i32 = arith.constant 0 : i32
    %c0_i32_0 = arith.constant 0 : i32
    return %c0_i32 : i32
  }
  func.func @transform_5(%arg0: i32, %arg1: i32) -> (i32, i32, i32) {
    %c0_i32 = arith.constant 0 : i32
    %c0_i32_0 = arith.constant 0 : i32
    return %arg0, %c0_i32, %arg1 : i32, i32, i32
  }
}

</mosaic_0001>

<bundles_post_ra>
// kernel: tpu_custom_call.1
= control target key start
LH: loop header
LB: loop body
LE: loop exit
PB: predicated region body
PF: predicated region fallthrough
CT: control target
= control target key end

     0   :  { %s2746_s0 = inlined_call_operand.hbm [shape: f32[2,16,256], index: 0, kind: input, shape index: {}]   ;;  %s2747_s1 = inlined_call_operand.vmem [shape: bf16[2,2,256], index: 1, kind: input, shape index: {}]   ;;  %s2748_s2 = inlined_call_operand.vmem [shape: bf16[2,2,256], index: 2, kind: input, shape index: {}]   ;;  %s2749_s3 = inlined_call_operand.hbm [shape: bf16[2,16,256], index: 3, kind: input, shape index: {}]   ;;  %s2750_s4 = inlined_call_operand.<no memory space> [shape: f32[1], index: 4, kind: input, shape index: {}]   ;;  %s2751_s5 = inlined_call_operand.hbm [shape: f32[2,16,256], index: 5, kind: output, shape index: {}]  }
   0x1   :  { %10 = sst [smem:[#allocation2]] %s2750_s4 }
   0x2   :  { %11 = vsyncpa [#allocation4], 0 }
   0x3   :  { %13 = vsyncpa [#allocation4 + $0x1], 0 }
   0x4   :  { %14 = vsyncpa [#allocation7], 0 }
   0x5   :  { %16 = vsyncpa [#allocation7 + $0x1], 0 }
   0x6   :  { %17 = vsyncpa [#allocation5], 0 }
   0x7   :  { %19 = vsyncpa [#allocation5 + $0x1], 0  ;;  %s1931_s20 = smov 0   ;;  %s1933_s21 = smov 0  }
   0x8   :  { %s1935_s22 = smov 0   ;;  %s1937_s23 = smov 0  }
   0x9   :  { %s1939_s24 = smov 0   ;;  %s1941_s25 = smov 0  }
   0xa LB: > { %s1424_s4 = sadd.s32 4294967295, %s1885_s25   ;;  %s1425_s26 = sadd.s32 4294967294, %s1885_s25   ;;  %s1885_s25 = sphi %s1941_s25, %s25_s25   ;;  %s1881_s24 = sphi %s1939_s24, %s2858_s24   ;;  %s1877_s23 = sphi %s1937_s23, %s2857_s23   ;;  %s1873_s22 = sphi %s1935_s22, %s2856_s22   ;;  %s1869_s21 = sphi %s1933_s21, %s2855_s21   ;;  %s1865_s20 = sphi %s1931_s20, %s2854_s20  }
   0xb   : > { %s37_s27 = sadd.s32 1, %s1881_s24  ;;  %s46_s28 = sadd.s32 1, %s1873_s22 }
   0xc   : > { %p39_p0 = scmp.ge.s32.totalorder %s37_s27, 2  ;;  %p53_p1 = scmp.ne.s32.totalorder %s1873_s22, %s1869_s21 }
   0xd   : > { %p54_p2 = scmp.eq.s32.totalorder %s1885_s25, 0  ;;  %p59_p3 = scmp.ne.s32.totalorder %s1869_s21, %s1865_s20 }
   0xe   : > { %s2860_s27 = smov (%p39_p0, %s37_s27), 0  ;;  %p60_p5 = scmp.eq.s32.totalorder %s1424_s4, 0 }
   0xf   : > { %p1972_p4 = por %p54_p2, %p53_p1  ;;  %s41_s30 = ssub.s32 %s1881_s24, %s2860_s27 }
  0x10   : > { %p186_p6 = scmp.eq.s32.totalorder %s1424_s4, 1  ;;  %p44_p7 = scmp.eq.s32.totalorder %s41_s30, 0 }
  0x11   : > { %p1978_p8 = por %p60_p5, %p59_p3  ;;  %p192_p10 = scmp.eq.s32.totalorder %s1425_s26, 1 }
  0x12   : > { %p1982_p9 = por %p186_p6, %p53_p1  ;;  %p1486_p13 = scmp.lt.s32.totalorder %s1885_s25, 2 }
  0x13   : > { %s2782_s6 = scalar_select %p1978_p8, 1, 0 }
  0x14   : > { %s2783_s7 = scalar_select %p1982_p9, 1, 0 }
  0x15   : > { %s1987_s8 = scalar_select %p44_p7, %s1873_s22, %s46_s28  }
  0x16   : > { %p1989_p11 = por %p192_p10, %p59_p3  ;;  %s1996_s10 = sand.u32 1, %s1873_s22  }
  0x17   : > { %s1428_s11 = sshll.u32 %s1996_s10, 5  ;;  %s1466_s12 = sshll.u32 %s1881_s24, 9 }
  0x18   : > { %s2784_s9 = scalar_select %p1989_p11, 1, 0 }
  0x19   : > { %s2003_s15 = scalar_lea.hbm %s2746_s0, %s1466_s12  ;;  %s219_s16 = scalar_lea.vmem [#allocation3], %s1428_s11 }
  0x1a   : > { %s228_s17 = sshll.u32 %s219_s16, 4  ;;  %p2009_p0 = pnand %p1486_p13, %p1972_p4  ;;  %s2005_s17 = int_to_ptr.vmem [resolvable:$true] %s228_s17 }
  0x1b   : > { %s216_s19 = scalar_lea.sflag [#allocation4], %s1996_s10  ;;  %s1739_s4 = scalar_lea.hbm %s2003_s15, 512 }
  0x1c   : > { %p1740_p2 = scmp.ne.s32.totalorder %s2003_s15, %s1739_s4  ;;  %p1741_p3 = pneg %p2009_p0 }
  0x1d   : > { %s1744_s29 = scalar_lea.hbm %s2746_s0, 1024  ;;  %p1745_p4 = scmp.lt.u32.totalorder %s2003_s15, %s2746_s0 }
  0x1e   : > { %p1742_p5 = pnand %p1741_p3, %p1740_p2  ;;  %p1746_p7 = scmp.lt.u32.totalorder %s1744_s29, %s1739_s4 }
  0x1f   : > { %p1748_p13 = scmp.lt.u32.totalorder %s1739_s4, %s2003_s15 }
  0x20   : > { %p1743_p6 = pneg %p1742_p5  ;;  %p1747_p10 = por %p1746_p7, %p1745_p4 }
  0x22   : > { %p1749_p12 = por %p1748_p13, %p1747_p10 }
  0x24   : > { %p1750_p1 = pnand %p1749_p12, %p1743_p6 }
  0x26   : > { %1753 = shalt.err (!%p1750_p1)
}
  0x27   : > { %s1754_s12 = scalar_lea.vmem %s2005_s17, 512  ;;  %s1887_s13 = smov [#allocation3]  }
  0x28   : > { %p1755_p2 = scmp.ne.s32.totalorder %s2005_s17, %s1754_s12  ;;  %s1759_s14 = sshll.u32 %s1887_s13, 4  ;;  %s1760_s14 = int_to_ptr.vmem [resolvable:$false] %s1759_s14 }
  0x29   : > { %s1761_s16 = scalar_lea.vmem %s1760_s14, 1024  ;;  %p1762_p9 = scmp.lt.s32.totalorder %s2005_s17, %s1760_s14 }
  0x2a   : > { %p1757_p5 = pnand %p1755_p2, %p1741_p3  ;;  %p1763_p4 = scmp.lt.s32.totalorder %s1761_s16, %s1754_s12 }
  0x2c   : > { %p1758_p11 = pneg %p1757_p5  ;;  %p1764_p7 = por %p1763_p4, %p1762_p9 }
  0x2e   : > { %p1765_p10 = pnand %p1764_p7, %p1758_p11 }
  0x30   : > { %1768 = shalt.err (!%p1765_p10)
}
  0x31   : > { %s1888_s4 = smov 256   ;;  %s1889_s26 = smov 16  }
  0x32   : > { %1478 = dma.hbm_to_vmem [thread:$0]  (!%p2009_p0), %s2003_s15, 512, %s2005_s17, %s216_s19, %s1888_s4, %s1888_s4, %s1889_s26  }
  0x33   : > { %p276_p12 = scmp.lt.s32.totalorder %s1885_s25, 3  ;;  %s1431_s28 = sshll.u32 %s1996_s10, 4 }
  0x34   : > { %s1467_s29 = sshll.u32 %s1881_s24, 8  ;;  %p2786_p9 = scmp.ge.s32.totalorder %s1885_s25, 1 }
  0x35   : > { %s2054_s13 = scalar_lea.hbm %s2749_s3, %s1467_s29  ;;  %s261_s14 = scalar_lea.vmem [#allocation6], %s1431_s28 }
  0x36   : > { %p2047_p11 = pnand %p2786_p9, %p276_p12  ;;  %s268_s16 = sshll.u32 %s261_s14, 4  ;;  %s2056_s16 = int_to_ptr.vmem [resolvable:$true] %s268_s16 }
  0x37   : > { %s258_s15 = scalar_lea.sflag [#allocation7], %s1996_s10  ;;  %s1769_s17 = scalar_lea.hbm %s2054_s13, 256 }
  0x38   : > { %p1770_p1 = scmp.ne.s32.totalorder %s2054_s13, %s1769_s17  ;;  %s1774_s26 = scalar_lea.hbm %s2749_s3, 512 }
  0x39   : > { %p1775_p2 = scmp.lt.u32.totalorder %s2054_s13, %s2749_s3  ;;  %p1776_p5 = scmp.lt.u32.totalorder %s1774_s26, %s1769_s17 }
  0x3a   : > { %p1772_p6 = pnand %p1770_p1, %p1741_p3  ;;  %p1778_p7 = scmp.lt.u32.totalorder %s1769_s17, %s2054_s13 }
  0x3b   : > { %p1777_p4 = por %p1776_p5, %p1775_p2 }
  0x3c   : > { %p1773_p13 = pneg %p1772_p6 }
  0x3d   : > { %p1779_p10 = por %p1778_p7, %p1777_p4 }
  0x3f   : > { %p1780_p12 = pnand %p1779_p10, %p1773_p13 }
  0x41   : > { %1783 = shalt.err (!%p1780_p12)
}
  0x42   : > { %s1784_s28 = scalar_lea.vmem %s2056_s16, 256  ;;  %s1890_s12 = smov [#allocation6]  }
  0x43   : > { %p1785_p9 = scmp.ne.s32.totalorder %s2056_s16, %s1784_s28  ;;  %s1789_s14 = sshll.u32 %s1890_s12, 4  ;;  %s1790_s14 = int_to_ptr.vmem [resolvable:$false] %s1789_s14 }
  0x44   : > { %s1791_s19 = scalar_lea.vmem %s1790_s14, 512  ;;  %p1792_p8 = scmp.lt.s32.totalorder %s2056_s16, %s1790_s14 }
  0x45   : > { %p1787_p1 = pnand %p1785_p9, %p1741_p3  ;;  %p1793_p2 = scmp.lt.s32.totalorder %s1791_s19, %s1784_s28 }
  0x47   : > { %p1788_p6 = pneg %p1787_p1  ;;  %p1794_p5 = por %p1793_p2, %p1792_p8 }
  0x49   : > { %p1795_p4 = pnand %p1794_p5, %p1788_p6 }
  0x4b   : > { %1798 = shalt.err (!%p1795_p4)
}
  0x4c   : > { %s1891_s17 = smov 128   ;;  %s1892_s4 = smov 8  }
  0x4d   : > { %1481 = dma.hbm_to_vmem [thread:$0]  (!%p2009_p0), %s2054_s13, 256, %s2056_s16, %s258_s15, %s1891_s17, %s1891_s17, %s1892_s4  }
  0x4e   : > { %280 = sbr.rel (%p2047_p11) target bundleno = 1170 (0x492), region = 40 }
  0x55   : > { %s2087_s26 = sand.u32 1, %s1869_s21   ;;  %p2788_p8 = scmp.ne.s32.totalorder %s2782_s6, 0 }
  0x56   : > { %s1435_s29 = sshll.u32 %s2087_s26, 5  ;;  %s283_s11 = scalar_lea.sflag [#allocation4], %s2087_s26 }
  0x57   : > { %s2093_s28 = scalar_lea.vmem [#allocation3], %s1435_s29 }
  0x58   : > { %1852 = dma.done.wait (%p2788_p8), %s283_s11, 512  }
  0x59   : > { %1854 = vsyncadd (%p2788_p8), %s283_s11, 4294966784  ;;  %s1436_s10 = sshll.u32 %s2087_s26, 4  ;;  %s292_s18 = scalar_lea.sflag [#allocation7], %s2087_s26 }
  0x5a   : > { %s2101_s30 = scalar_lea.vmem [#allocation6], %s1436_s10 }
  0x5b   : > { %1856 = dma.done.wait (%p2788_p8), %s292_s18, 256  }
  0x5c   : > { %1858 = vsyncadd (%p2788_p8), %s292_s18, 4294967040  ;;  %p341_p0 = scmp.lt.s32.totalorder %s1877_s23, 1  ;;  %v369_v0 = vlaneseq  ;;  %v1893_v1 = vmov 1966171168   ;;  %v1894_v3 = vmov 0   ;;  %vm486_vm0 = vcmask 1040384  }
  0x5d   : > { %v367_v2 = vunpack.c.l.s4 %v1893_v1  ;;  %525 = vmatprep.mubr.bf16.mxu0 %v1894_v3  ;;  %vm437_vm1 = vcmask 15360   ;;  %s1253_s4 = sld [smem:[#allocation2]]  ;;  %s338_s11 = scalar_lea.vmem [#allocation8], %s1435_s29 }
  0x5e   : > { %s342_s13 = scalar_select %p341_p0, %s1877_s23, 1  ;;  %v370_v4 = vshrl.u32 %v369_v0, 7 }
  0x5f   : > { %v368_v5 = vunpack.c.0.s8 %v367_v2  ;;  %s1287_s10 = sshll.u32 %s338_s11, 4  ;;  %s1468_s18 = sshll.u32 %s1877_s23, 9  ;;  %s2692_s10 = int_to_ptr.vmem [resolvable:$true] %s1287_s10 }
  0x60   : > { %s1438_s16 = sshll.u32 %s342_s13, 1  ;;  %s2697_s13 = scalar_lea.hbm %s2751_s5, %s1468_s18 }
  0x61   : > { %s347_s14 = scalar_lea.vmem %s2747_s1, %s1438_s16  ;;  %s352_s17 = scalar_lea.vmem %s2748_s2, %s1438_s16  ;;  %v371_v6 = vsub.s32 %v368_v5, %v370_v4 }
  0x62   : > { %v1440_v7 = vld.sshfl [vmem:[%s347_s14] sm:$0x11 pattern:$0x75316420]  ;;  %s1272_s23 = scalar_lea.sflag [#allocation5], %s2087_s26  ;;  %p2851_p11 = scmp.ne.s32.totalorder %s2783_s7, 0 }
  0x63   : > { %v372_v8 = vrot.slane %v1440_v7, %v371_v6  ;;  %v1441_v9 = vld.sshfl [vmem:[%s352_s17] sm:$0x11 pattern:$0x75316420]  ;;  %v365_v14 = vcombine.high %v1440_v7, %v1440_v7  ;;  %s1895_s16 = smov [#allocation8]  }
  0x64   : > { %v422_v10 = vcombine.high %v1441_v9, %v1441_v9  ;;  %v429_v11 = vrot.slane %v1441_v9, %v371_v6  ;;  %s1803_s15 = sshll.u32 %s1895_s16, 4  ;;  %s1804_s15 = int_to_ptr.vmem [resolvable:$false] %s1803_s15 }
  0x65   : > { %382 = vxpose.xlu0.c.b16.start.end [1/1] (short) %v372_v8, 128  ;;  %v379_v15 = vrot.slane %v365_v14, %v371_v6  ;;  %s1805_s12 = scalar_lea.vmem %s1804_s15, 1024  ;;  %p1806_p10 = scmp.lt.s32.totalorder %s2692_s10, %s1804_s15 }
  0x66   : > { %v436_v12 = vrot.slane %v422_v10, %v371_v6  ;;  %v488_v13 = vsel %vm486_vm0, %v429_v11, 0 }
  0x68   : > { %1442 = vmatprep.subr.msk.bf16.mxu0 %vm486_vm0, %v436_v12 }
  0x69   : > { %494 = vmatpush1.bf16.msra.mxu0 %v488_v13 }
  0x82   : > { %398 = vxpose.xlu0.c.b16.start.end [1/1] (short) %v379_v15, 128 }
  0xcb   : > { %v390_v16 = vpop.trf.xlu0 }
  0xcc   : > { %1443 = vmatmul.mubr.msk.bf16.vlgmr.msra.gmra.mrb[0].mxu0 %vm437_vm1, %v390_v16 }
  0xcd   : > { %535 = vmatprep.mubr.bf16.mxu0 %v1894_v3 }
  0xcf   : > { %v391_v17 = vpop.trf.xlu0 }
  0xd3   : > { %v392_v18 = vpop.trf.xlu0 }
  0xd4   : > { %1444 = vmatmul.mubr.msk.bf16.gmra.mrb[4].mxu0 %vm437_vm1, %v391_v17 }
  0xd5   : > { %545 = vmatprep.mubr.bf16.mxu0 %v1894_v3 }
  0xd7   : > { %v393_v19 = vpop.trf.xlu0 }
  0xdb   : > { %v394_v20 = vpop.trf.xlu0 }
  0xdc   : > { %1445 = vmatmul.mubr.msk.bf16.gmra.mrb[8].mxu0 %vm437_vm1, %v392_v18 }
  0xdd   : > { %555 = vmatprep.mubr.bf16.mxu0 %v1894_v3 }
  0xdf   : > { %v395_v21 = vpop.trf.xlu0 }
  0xe3   : > { %v396_v22 = vpop.trf.xlu0 }
  0xe4   : > { %1446 = vmatmul.mubr.msk.bf16.gmra.mrb[12].mxu0 %vm437_vm1, %v393_v19 }
  0xe5   : > { %565 = vmatprep.mubr.bf16.mxu0 %v1894_v3 }
  0xe7   : > { %v397_v23 = vpop.trf.xlu0 }
  0xeb   : > { %v406_v24 = vpop.trf.xlu0 }
  0xec   : > { %1447 = vmatmul.mubr.msk.bf16.gmra.mrb[16].mxu0 %vm437_vm1, %v394_v20 }
  0xed   : > { %575 = vmatprep.mubr.bf16.mxu0 %v1894_v3 }
  0xef   : > { %v407_v25 = vpop.trf.xlu0 }
  0xf3   : > { %v408_v26 = vpop.trf.xlu0 }
  0xf4   : > { %1448 = vmatmul.mubr.msk.bf16.gmra.mrb[20].mxu0 %vm437_vm1, %v395_v21 }
  0xf5   : > { %585 = vmatprep.mubr.bf16.mxu0 %v1894_v3 }
  0xf7   : > { %v409_v27 = vpop.trf.xlu0 }
  0xfb   : > { %v410_v28 = vpop.trf.xlu0 }
  0xfc   : > { %1449 = vmatmul.mubr.msk.bf16.gmra.mrb[24].mxu0 %vm437_vm1, %v396_v22 }
  0xfd   : > { %595 = vmatprep.mubr.bf16.mxu0 %v1894_v3 }
  0xff   : > { %v411_v29 = vpop.trf.xlu0 }
 0x103   : > { %v412_v30 = vpop.trf.xlu0 }
 0x104   : > { %1450 = vmatmul.mubr.msk.bf16.gmra.mrb[28].mxu0 %vm437_vm1, %v397_v23 }
 0x105   : > { %605 = vmatprep.mubr.bf16.mxu0 %v1894_v3 }
 0x107   : > { %v413_v31 = vpop.trf.xlu0 }
 0x10c   : > { %1451 = vmatmul.mubr.msk.bf16.gmra.mrb[32].mxu0 %vm437_vm1, %v406_v24 }
 0x10d   : > { %615 = vmatprep.mubr.bf16.mxu0 %v1894_v3 }
 0x114   : > { %1452 = vmatmul.mubr.msk.bf16.gmra.mrb[36].mxu0 %vm437_vm1, %v407_v25 }
 0x115   : > { %625 = vmatprep.mubr.bf16.mxu0 %v1894_v3 }
 0x11c   : > { %1453 = vmatmul.mubr.msk.bf16.gmra.mrb[40].mxu0 %vm437_vm1, %v408_v26 }
 0x11d   : > { %635 = vmatprep.mubr.bf16.mxu0 %v1894_v3 }
 0x124   : > { %1454 = vmatmul.mubr.msk.bf16.gmra.mrb[44].mxu0 %vm437_vm1, %v409_v27 }
 0x125   : > { %645 = vmatprep.mubr.bf16.mxu0 %v1894_v3 }
 0x12c   : > { %1455 = vmatmul.mubr.msk.bf16.gmra.mrb[48].mxu0 %vm437_vm1, %v410_v28 }
 0x12d   : > { %655 = vmatprep.mubr.bf16.mxu0 %v1894_v3 }
 0x134   : > { %1456 = vmatmul.mubr.msk.bf16.gmra.mrb[52].mxu0 %vm437_vm1, %v411_v29 }
 0x135   : > { %665 = vmatprep.mubr.bf16.mxu0 %v1894_v3 }
 0x13c   : > { %1457 = vmatmul.mubr.msk.bf16.gmra.mrb[56].mxu0 %vm437_vm1, %v412_v30 }
 0x13d   : > { %675 = vmatprep.mubr.bf16.mxu0 %v1894_v3 }
 0x144   : > { %1458 = vmatmul.mubr.msk.bf16.gmra.mrb[60].mxu0 %vm437_vm1, %v413_v31 }
 0x19f   : > { %v2147_v32 = vpop.f32.mrb[0].mxu0 }
 0x1a0   : > { %v2149_v33 = vpop.f32.mrb[1].mxu0 }
 0x1a1   : > { %v2151_v34 = vpop.f32.mrb[2].mxu0  ;;  %v686_v35 = vmax.f32 %v2147_v32, %v2149_v33 }
 0x1a2   : > { %v2155_v36 = vpop.f32.mrb[3].mxu0 }
 0x1a3   : > { %687 = vmax.xlane.f32.xlu1 %v686_v35  ;;  %v689_v37 = vmax.f32 %v2151_v34, %v2155_v36 }
 0x1a7   : > { %690 = vmax.xlane.f32.xlu1 %v689_v37  ;;  %v2159_v38 = vpop.f32.mrb[4].mxu0 }
 0x1a8   : > { %v2161_v39 = vpop.f32.mrb[5].mxu0 }
 0x1a9   : > { %v2163_v40 = vpop.f32.mrb[6].mxu0  ;;  %v692_v41 = vmax.f32 %v2159_v38, %v2161_v39 }
 0x1aa   : > { %v2167_v42 = vpop.f32.mrb[7].mxu0 }
 0x1ab   : > { %693 = vmax.xlane.f32.xlu1 %v692_v41  ;;  %v695_v43 = vmax.f32 %v2163_v40, %v2167_v42 }
 0x1af   : > { %696 = vmax.xlane.f32.xlu1 %v695_v43  ;;  %v2171_v44 = vpop.f32.mrb[8].mxu0 }
 0x1b0   : > { %v2173_v45 = vpop.f32.mrb[9].mxu0 }
 0x1b1   : > { %v2175_v46 = vpop.f32.mrb[10].mxu0  ;;  %v698_v47 = vmax.f32 %v2171_v44, %v2173_v45 }
 0x1b2   : > { %v2179_v48 = vpop.f32.mrb[11].mxu0 }
 0x1b3   : > { %699 = vmax.xlane.f32.xlu1 %v698_v47  ;;  %v701_v49 = vmax.f32 %v2175_v46, %v2179_v48 }
 0x1b7   : > { %702 = vmax.xlane.f32.xlu1 %v701_v49  ;;  %v2183_v50 = vpop.f32.mrb[12].mxu0 }
 0x1b8   : > { %v2185_v51 = vpop.f32.mrb[13].mxu0 }
 0x1b9   : > { %v2187_v52 = vpop.f32.mrb[14].mxu0  ;;  %v704_v53 = vmax.f32 %v2183_v50, %v2185_v51 }
 0x1ba   : > { %v2191_v54 = vpop.f32.mrb[15].mxu0 }
 0x1bb   : > { %705 = vmax.xlane.f32.xlu1 %v704_v53  ;;  %v707_v55 = vmax.f32 %v2187_v52, %v2191_v54 }
 0x1bf   : > { %708 = vmax.xlane.f32.xlu1 %v707_v55  ;;  %v2195_v56 = vpop.f32.mrb[16].mxu0 }
 0x1c0   : > { %v2197_v57 = vpop.f32.mrb[17].mxu0 }
 0x1c1   : > { %v2199_v58 = vpop.f32.mrb[18].mxu0  ;;  %v710_v59 = vmax.f32 %v2195_v56, %v2197_v57 }
 0x1c2   : > { %v2203_v60 = vpop.f32.mrb[19].mxu0 }
 0x1c3   : > { %711 = vmax.xlane.f32.xlu1 %v710_v59  ;;  %v713_v61 = vmax.f32 %v2199_v58, %v2203_v60 }
 0x1c5   : > { %714 = vmax.xlane.f32.xlu0 %v713_v61 }
 0x1c7   : > { %v2207_v62 = vpop.f32.mrb[20].mxu0 }
 0x1c8   : > { %v2209_v63 = vpop.f32.mrb[21].mxu0 }
 0x1c9   : > { %v716_v0 = vmax.f32 %v2207_v62, %v2209_v63  ;;  %v2213_v1 = vpop.f32.mrb[22].mxu0 }
 0x1ca   : > { %v2215_v2 = vpop.f32.mrb[23].mxu0 }
 0x1cb   : > { %717 = vmax.xlane.f32.xlu1 %v716_v0  ;;  %v719_v3 = vmax.f32 %v2213_v1, %v2215_v2 }
 0x1cf   : > { %720 = vmax.xlane.f32.xlu1 %v719_v3  ;;  %v2219_v4 = vpop.f32.mrb[24].mxu0 }
 0x1d0   : > { %v2221_v5 = vpop.f32.mrb[25].mxu0 }
 0x1d1   : > { %v722_v6 = vmax.f32 %v2219_v4, %v2221_v5  ;;  %v2225_v7 = vpop.f32.mrb[26].mxu0 }
 0x1d2   : > { %v2227_v8 = vpop.f32.mrb[27].mxu0 }
 0x1d3   : > { %723 = vmax.xlane.f32.xlu1 %v722_v6  ;;  %v725_v9 = vmax.f32 %v2225_v7, %v2227_v8 }
 0x1d7   : > { %726 = vmax.xlane.f32.xlu1 %v725_v9  ;;  %v2231_v10 = vpop.f32.mrb[28].mxu0 }
 0x1d8   : > { %v2233_v11 = vpop.f32.mrb[29].mxu0 }
 0x1d9   : > { %v728_v12 = vmax.f32 %v2231_v10, %v2233_v11  ;;  %v2237_v13 = vpop.f32.mrb[30].mxu0 }
 0x1da   : > { %v2239_v14 = vpop.f32.mrb[31].mxu0 }
 0x1db   : > { %729 = vmax.xlane.f32.xlu1 %v728_v12  ;;  %v731_v15 = vmax.f32 %v2237_v13, %v2239_v14 }
 0x1df   : > { %732 = vmax.xlane.f32.xlu1 %v731_v15  ;;  %v2243_v16 = vpop.f32.mrb[32].mxu0 }
 0x1e0   : > { %v2245_v17 = vpop.f32.mrb[33].mxu0 }
 0x1e1   : > { %v734_v18 = vmax.f32 %v2243_v16, %v2245_v17  ;;  %v2249_v19 = vpop.f32.mrb[34].mxu0 }
 0x1e2   : > { %v2251_v20 = vpop.f32.mrb[35].mxu0 }
 0x1e3   : > { %2789 = vst [vmem:[#allocation12_spill] sm:$0xff] %v2251_v20  ;;  %735 = vmax.xlane.f32.xlu1 %v734_v18  ;;  %v737_v21 = vmax.f32 %v2249_v19, %v2251_v20 }
 0x1e7   : > { %738 = vmax.xlane.f32.xlu1 %v737_v21  ;;  %v2255_v22 = vpop.f32.mrb[36].mxu0 }
 0x1e8   : > { %2790 = vst [vmem:[#allocation13_spill] sm:$0xff] %v2255_v22  ;;  %v2257_v23 = vpop.f32.mrb[37].mxu0 }
 0x1e9   : > { %2791 = vst [vmem:[#allocation14_spill] sm:$0xff] %v2257_v23  ;;  %v740_v24 = vmax.f32 %v2255_v22, %v2257_v23  ;;  %v2261_v25 = vpop.f32.mrb[38].mxu0 }
 0x1ea   : > { %2792 = vst [vmem:[#allocation15_spill] sm:$0xff] %v2261_v25  ;;  %v2263_v26 = vpop.f32.mrb[39].mxu0 }
 0x1eb   : > { %2793 = vst [vmem:[#allocation16_spill] sm:$0xff] %v2263_v26  ;;  %741 = vmax.xlane.f32.xlu1 %v740_v24  ;;  %v743_v27 = vmax.f32 %v2261_v25, %v2263_v26 }
 0x1ef   : > { %744 = vmax.xlane.f32.xlu1 %v743_v27  ;;  %v2267_v28 = vpop.f32.mrb[40].mxu0 }
 0x1f0   : > { %2794 = vst [vmem:[#allocation17_spill] sm:$0xff] %v2267_v28  ;;  %v2269_v29 = vpop.f32.mrb[41].mxu0 }
 0x1f1   : > { %2795 = vst [vmem:[#allocation18_spill] sm:$0xff] %v2269_v29  ;;  %v2271_v30 = vpop.f32.mrb[42].mxu0  ;;  %v746_v31 = vmax.f32 %v2267_v28, %v2269_v29 }
 0x1f2   : > { %2796 = vst [vmem:[#allocation19_spill] sm:$0xff] %v2271_v30  ;;  %v2275_v35 = vpop.f32.mrb[43].mxu0 }
 0x1f3   : > { %2797 = vst [vmem:[#allocation20_spill] sm:$0xff] %v2275_v35  ;;  %747 = vmax.xlane.f32.xlu0 %v746_v31  ;;  %v749_v37 = vmax.f32 %v2271_v30, %v2275_v35 }
 0x1f5   : > { %750 = vmax.xlane.f32.xlu1 %v749_v37 }
 0x1f7   : > { %v2279_v41 = vpop.f32.mrb[44].mxu0 }
 0x1f8   : > { %2798 = vst [vmem:[#allocation21_spill] sm:$0xff] %v2279_v41  ;;  %v2281_v43 = vpop.f32.mrb[45].mxu0 }
 0x1f9   : > { %2799 = vst [vmem:[#allocation22_spill] sm:$0xff] %v2281_v43  ;;  %v2283_v47 = vpop.f32.mrb[46].mxu0  ;;  %v752_v49 = vmax.f32 %v2279_v41, %v2281_v43 }
 0x1fa   : > { %2800 = vst [vmem:[#allocation23_spill] sm:$0xff] %v2283_v47  ;;  %v2287_v53 = vpop.f32.mrb[47].mxu0 }
 0x1fb   : > { %2801 = vst [vmem:[#allocation24_spill] sm:$0xff] %v2287_v53  ;;  %753 = vmax.xlane.f32.xlu0 %v752_v49  ;;  %v755_v55 = vmax.f32 %v2283_v47, %v2287_v53 }
 0x1fd   : > { %756 = vmax.xlane.f32.xlu1 %v755_v55 }
 0x1ff   : > { %v2291_v59 = vpop.f32.mrb[48].mxu0 }
 0x200   : > { %v2293_v61 = vpop.f32.mrb[49].mxu0 }
 0x201   : > { %v2295_v0 = vpop.f32.mrb[50].mxu0 }
 0x202   : > { %v2299_v6 = vpop.f32.mrb[51].mxu0 }
 0x207   : > { %v2303_v12 = vpop.f32.mrb[52].mxu0 }
 0x208   : > { %v2305_v15 = vpop.f32.mrb[53].mxu0 }
 0x209   : > { %v2307_v18 = vpop.f32.mrb[54].mxu0 }
 0x20a   : > { %v2311_v24 = vpop.f32.mrb[55].mxu0 }
 0x20f   : > { %v2315_v31 = vpop.f32.mrb[56].mxu0 }
 0x210   : > { %v2317_v37 = vpop.f32.mrb[57].mxu0 }
 0x211   : > { %v2319_v49 = vpop.f32.mrb[58].mxu0 }
 0x212   : > { %v2323_v9 = vpop.f32.mrb[59].mxu0 }
 0x217   : > { %v2327_v21 = vpop.f32.mrb[60].mxu0 }
 0x218   : > { %v2329_v53 = vpop.f32.mrb[61].mxu0 }
 0x219   : > { %v2331_v47 = vpop.f32.mrb[62].mxu0 }
 0x21a   : > { %v2335_v43 = vpop.f32.mrb[63].mxu0 }
 0x230   : > { %v688_v55 = vpop.xlane.xlu1 %687 }
 0x231   : > { %v782_v35 = vsub.f32 %v2147_v32, %v688_v55  ;;  %v783_v30 = vsub.f32 %v2149_v33, %v688_v55 }
 0x233   : > { %v846_v3 = vmul.f32 1.442695, %v782_v35  ;;  %v848_v29 = vmul.f32 1.442695, %v783_v30 }
 0x234   : > { %v691_v28 = vpop.xlane.xlu1 %690 }
 0x235   : > { %1547 = vpow2.f32 %v846_v3  ;;  %v784_v26 = vsub.f32 %v2151_v34, %v691_v28  ;;  %v785_v25 = vsub.f32 %v2155_v36, %v691_v28 }
 0x236   : > { %1549 = vpow2.f32 %v848_v29 }
 0x237   : > { %v850_v27 = vmul.f32 1.442695, %v784_v26  ;;  %v852_v23 = vmul.f32 1.442695, %v785_v25 }
 0x238   : > { %v694_v22 = vpop.xlane.xlu1 %693 }
 0x239   : > { %1551 = vpow2.f32 %v850_v27  ;;  %v786_v41 = vsub.f32 %v2159_v38, %v694_v22  ;;  %v787_v20 = vsub.f32 %v2161_v39, %v694_v22 }
 0x23a   : > { %1553 = vpow2.f32 %v852_v23 }
 0x23b   : > { %v854_v32 = vmul.f32 1.442695, %v786_v41  ;;  %v856_v33 = vmul.f32 1.442695, %v787_v20 }
 0x23c   : > { %v697_v35 = vpop.xlane.xlu1 %696 }
 0x23d   : > { %1555 = vpow2.f32 %v854_v32  ;;  %v788_v30 = vsub.f32 %v2163_v40, %v697_v35  ;;  %v789_v34 = vsub.f32 %v2167_v42, %v697_v35 }
 0x23e   : > { %1557 = vpow2.f32 %v856_v33  ;;  %v2802_v33 = vmax.f32 %v2291_v59, %v2293_v61 }
 0x23f   : > { %v2347_v36 = vpop.eup %1547  ;;  %v858_v26 = vmul.f32 1.442695, %v788_v30  ;;  %v860_v25 = vmul.f32 1.442695, %v789_v34 }
 0x240   : > { %v2349_v28 = vpop.eup %1549  ;;  %v700_v29 = vpop.xlane.xlu1 %699 }
 0x241   : > { %1559 = vpow2.f32 %v858_v26  ;;  %v790_v38 = vsub.f32 %v2171_v44, %v700_v29  ;;  %v791_v39 = vsub.f32 %v2173_v45, %v700_v29  ;;  %v974_v20 = vadd.f32 %v2349_v28, %v2347_v36 }
 0x242   : > { %1561 = vpow2.f32 %v860_v25 }
 0x243   : > { %v2355_v40 = vpop.eup %1551  ;;  %v862_v42 = vmul.f32 1.442695, %v790_v38  ;;  %v864_v22 = vmul.f32 1.442695, %v791_v39  ;;  %975 = vadd.xlane.f32.xlu0 %v974_v20  ;;  %v2803_v38 = vmax.f32 %v2295_v0, %v2299_v6 }
 0x244   : > { %v2357_v23 = vpop.eup %1553  ;;  %v703_v41 = vpop.xlane.xlu1 %702 }
 0x245   : > { %1563 = vpow2.f32 %v862_v42  ;;  %v792_v3 = vsub.f32 %v2175_v46, %v703_v41  ;;  %v793_v27 = vsub.f32 %v2179_v48, %v703_v41  ;;  %v977_v44 = vadd.f32 %v2357_v23, %v2355_v40 }
 0x246   : > { %1565 = vpow2.f32 %v864_v22 }
 0x247   : > { %v2363_v45 = vpop.eup %1555  ;;  %v866_v55 = vmul.f32 1.442695, %v792_v3  ;;  %v868_v32 = vmul.f32 1.442695, %v793_v27  ;;  %978 = vadd.xlane.f32.xlu1 %v977_v44  ;;  %759 = vmax.xlane.f32.xlu0 %v2802_v33  ;;  %v2804_v27 = vmax.f32 %v2303_v12, %v2305_v15 }
 0x248   : > { %v2368_v35 = vpop.eup %1557  ;;  %v706_v30 = vpop.xlane.xlu1 %705 }
 0x249   : > { %1567 = vpow2.f32 %v866_v55  ;;  %v794_v46 = vsub.f32 %v2183_v50, %v706_v30  ;;  %v795_v48 = vsub.f32 %v2185_v51, %v706_v30  ;;  %v980_v34 = vadd.f32 %v2368_v35, %v2363_v45 }
 0x24a   : > { %1569 = vpow2.f32 %v868_v32 }
 0x24b   : > { %v2374_v26 = vpop.eup %1559  ;;  %v870_v25 = vmul.f32 1.442695, %v794_v46  ;;  %v872_v29 = vmul.f32 1.442695, %v795_v48  ;;  %981 = vadd.xlane.f32.xlu0 %v980_v34  ;;  %762 = vmax.xlane.f32.xlu1 %v2803_v38  ;;  %v2805_v34 = vmax.f32 %v2307_v18, %v2311_v24 }
 0x24c   : > { %v2379_v39 = vpop.eup %1561  ;;  %v709_v20 = vpop.xlane.xlu1 %708 }
 0x24d   : > { %1571 = vpow2.f32 %v870_v25  ;;  %v796_v50 = vsub.f32 %v2187_v52, %v709_v20  ;;  %v797_v51 = vsub.f32 %v2191_v54, %v709_v20  ;;  %v983_v42 = vadd.f32 %v2379_v39, %v2374_v26 }
 0x24e   : > { %1573 = vpow2.f32 %v872_v29 }
 0x24f   : > { %v2385_v22 = vpop.eup %1563  ;;  %v874_v41 = vmul.f32 1.442695, %v796_v50  ;;  %v876_v3 = vmul.f32 1.442695, %v797_v51  ;;  %984 = vadd.xlane.f32.xlu1 %v983_v42  ;;  %765 = vmax.xlane.f32.xlu0 %v2804_v27  ;;  %v2806_v51 = vmax.f32 %v2315_v31, %v2317_v37 }
 0x250   : > { %v2390_v44 = vpop.eup %1565  ;;  %v712_v55 = vpop.xlane.xlu1 %711 }
 0x251   : > { %1575 = vpow2.f32 %v874_v41  ;;  %v798_v52 = vsub.f32 %v2195_v56, %v712_v55  ;;  %v799_v54 = vsub.f32 %v2197_v57, %v712_v55  ;;  %v986_v32 = vadd.f32 %v2390_v44, %v2385_v22 }
 0x252   : > { %1577 = vpow2.f32 %v876_v3  ;;  %v715_v33 = vpop.xlane.xlu0 %714 }
 0x253   : > { %v2396_v30 = vpop.eup %1567  ;;  %v878_v46 = vmul.f32 1.442695, %v798_v52  ;;  %v880_v48 = vmul.f32 1.442695, %v799_v54  ;;  %987 = vadd.xlane.f32.xlu0 %v986_v32  ;;  %768 = vmax.xlane.f32.xlu1 %v2805_v34  ;;  %v800_v25 = vsub.f32 %v2199_v58, %v715_v33  ;;  %v801_v56 = vsub.f32 %v2203_v60, %v715_v33 }
 0x254   : > { %v2403_v29 = vpop.eup %1569  ;;  %v2807_v54 = vmax.f32 %v2319_v49, %v2323_v9 }
 0x255   : > { %1579 = vpow2.f32 %v878_v46  ;;  %v882_v57 = vmul.f32 1.442695, %v800_v25  ;;  %v884_v38 = vmul.f32 1.442695, %v801_v56  ;;  %v989_v20 = vadd.f32 %v2403_v29, %v2396_v30 }
 0x256   : > { %1581 = vpow2.f32 %v880_v48  ;;  %v2808_v56 = vmax.f32 %v2327_v21, %v2329_v53 }
 0x257   : > { %v2407_v50 = vpop.eup %1571  ;;  %1583 = vpow2.f32 %v882_v57  ;;  %990 = vadd.xlane.f32.xlu1 %v989_v20  ;;  %771 = vmax.xlane.f32.xlu0 %v2806_v51 }
 0x258   : > { %v2412_v58 = vpop.eup %1573  ;;  %1585 = vpow2.f32 %v884_v38  ;;  %v718_v60 = vpop.xlane.xlu1 %717 }
 0x259   : > { %v802_v42 = vsub.f32 %v2207_v62, %v718_v60  ;;  %v803_v41 = vsub.f32 %v2209_v63, %v718_v60  ;;  %v992_v3 = vadd.f32 %v2412_v58, %v2407_v50 }
 0x25b   : > { %v2418_v27 = vpop.eup %1575  ;;  %v886_v55 = vmul.f32 1.442695, %v802_v42  ;;  %v888_v52 = vmul.f32 1.442695, %v803_v41  ;;  %993 = vadd.xlane.f32.xlu0 %v992_v3  ;;  %774 = vmax.xlane.f32.xlu1 %v2807_v54  ;;  %v2809_v3 = vmax.f32 %v2331_v47, %v2335_v43 }
 0x25c   : > { %v2423_v32 = vpop.eup %1577  ;;  %v721_v33 = vpop.xlane.xlu1 %720 }
 0x25d   : > { %1587 = vpow2.f32 %v886_v55  ;;  %v804_v62 = vsub.f32 %v2213_v1, %v721_v33  ;;  %v805_v63 = vsub.f32 %v2215_v2, %v721_v33  ;;  %v995_v46 = vadd.f32 %v2423_v32, %v2418_v27 }
 0x25e   : > { %1589 = vpow2.f32 %v888_v52 }
 0x25f   : > { %v2429_v48 = vpop.eup %1579  ;;  %v890_v34 = vmul.f32 1.442695, %v804_v62  ;;  %v892_v25 = vmul.f32 1.442695, %v805_v63  ;;  %996 = vadd.xlane.f32.xlu1 %v995_v46  ;;  %777 = vmax.xlane.f32.xlu0 %v2808_v56 }
 0x260   : > { %v2434_v57 = vpop.eup %1581  ;;  %v724_v38 = vpop.xlane.xlu1 %723 }
 0x261   : > { %v2436_v20 = vpop.eup %1583  ;;  %1591 = vpow2.f32 %v890_v34  ;;  %v806_v1 = vsub.f32 %v2219_v4, %v724_v38  ;;  %v807_v2 = vsub.f32 %v2221_v5, %v724_v38  ;;  %v998_v51 = vadd.f32 %v2434_v57, %v2429_v48 }
 0x262   : > { %v2442_v60 = vpop.eup %1585  ;;  %1593 = vpow2.f32 %v892_v25 }
 0x263   : > { %v894_v42 = vmul.f32 1.442695, %v806_v1  ;;  %v896_v41 = vmul.f32 1.442695, %v807_v2  ;;  %999 = vadd.xlane.f32.xlu0 %v998_v51  ;;  %780 = vmax.xlane.f32.xlu1 %v2809_v3  ;;  %v1001_v5 = vadd.f32 %v2442_v60, %v2436_v20 }
 0x264   : > { %v727_v55 = vpop.xlane.xlu1 %726 }
 0x265   : > { %1595 = vpow2.f32 %v894_v42  ;;  %v808_v52 = vsub.f32 %v2225_v7, %v727_v55  ;;  %v809_v4 = vsub.f32 %v2227_v8, %v727_v55 }
 0x266   : > { %1597 = vpow2.f32 %v896_v41 }
 0x267   : > { %v2451_v54 = vpop.eup %1587  ;;  %v898_v33 = vmul.f32 1.442695, %v808_v52  ;;  %v900_v62 = vmul.f32 1.442695, %v809_v4  ;;  %1002 = vadd.xlane.f32.xlu1 %v1001_v5 }
 0x268   : > { %v2453_v63 = vpop.eup %1589  ;;  %v730_v46 = vpop.xlane.xlu1 %729 }
 0x269   : > { %1599 = vpow2.f32 %v898_v33  ;;  %v810_v34 = vsub.f32 %v2231_v10, %v730_v46  ;;  %v811_v25 = vsub.f32 %v2233_v11, %v730_v46  ;;  %v1004_v7 = vadd.f32 %v2453_v63, %v2451_v54 }
 0x26a   : > { %1601 = vpow2.f32 %v900_v62 }
 0x26b   : > { %v2459_v8 = vpop.eup %1591  ;;  %v902_v56 = vmul.f32 1.442695, %v810_v34  ;;  %v904_v38 = vmul.f32 1.442695, %v811_v25  ;;  %1005 = vadd.xlane.f32.xlu0 %v1004_v7  ;;  %v2810_v7 = vld [vmem:[#allocation12_spill] sm:$0xff] }
 0x26c   : > { %v2461_v1 = vpop.eup %1593  ;;  %v733_v2 = vpop.xlane.xlu1 %732 }
 0x26d   : > { %1603 = vpow2.f32 %v902_v56  ;;  %v812_v51 = vsub.f32 %v2237_v13, %v733_v2  ;;  %v813_v42 = vsub.f32 %v2239_v14, %v733_v2  ;;  %v1007_v10 = vadd.f32 %v2461_v1, %v2459_v8 }
 0x26e   : > { %1605 = vpow2.f32 %v904_v38 }
 0x26f   : > { %v2467_v11 = vpop.eup %1595  ;;  %v906_v41 = vmul.f32 1.442695, %v812_v51  ;;  %v908_v3 = vmul.f32 1.442695, %v813_v42  ;;  %1008 = vadd.xlane.f32.xlu1 %v1007_v10  ;;  %v2812_v10 = vld [vmem:[#allocation13_spill] sm:$0xff] }
 0x270   : > { %v2469_v55 = vpop.eup %1597  ;;  %v736_v52 = vpop.xlane.xlu1 %735 }
 0x271   : > { %1607 = vpow2.f32 %v906_v41  ;;  %v814_v4 = vsub.f32 %v2243_v16, %v736_v52  ;;  %v815_v5 = vsub.f32 %v2245_v17, %v736_v52  ;;  %v1010_v13 = vadd.f32 %v2469_v55, %v2467_v11 }
 0x272   : > { %1609 = vpow2.f32 %v908_v3  ;;  %v2813_v3 = vld [vmem:[#allocation14_spill] sm:$0xff] }
 0x273   : > { %v2475_v14 = vpop.eup %1599  ;;  %v910_v33 = vmul.f32 1.442695, %v814_v4  ;;  %v912_v62 = vmul.f32 1.442695, %v815_v5  ;;  %1011 = vadd.xlane.f32.xlu0 %v1010_v13 }
 0x274   : > { %v2477_v46 = vpop.eup %1601  ;;  %v739_v34 = vpop.xlane.xlu1 %738 }
 0x275   : > { %1611 = vpow2.f32 %v910_v33  ;;  %v816_v25 = vsub.f32 %v2249_v19, %v739_v34  ;;  %v817_v56 = vsub.f32 %v2810_v7, %v739_v34  ;;  %v1013_v16 = vadd.f32 %v2477_v46, %v2475_v14  ;;  %v2816_v34 = vld [vmem:[#allocation15_spill] sm:$0xff]  ;;  %v2817_v7 = vld [vmem:[#allocation16_spill] sm:$0xff] }
 0x276   : > { %1613 = vpow2.f32 %v912_v62 }
 0x277   : > { %v2483_v17 = vpop.eup %1603  ;;  %v914_v38 = vmul.f32 1.442695, %v816_v25  ;;  %v916_v2 = vmul.f32 1.442695, %v817_v56  ;;  %1014 = vadd.xlane.f32.xlu1 %v1013_v16 }
 0x278   : > { %2811 = vst [vmem:[#allocation12_spill] sm:$0xff] %v2483_v17  ;;  %v2485_v51 = vpop.eup %1605  ;;  %v742_v42 = vpop.xlane.xlu1 %741 }
 0x279   : > { %1615 = vpow2.f32 %v914_v38  ;;  %v818_v41 = vsub.f32 %v2812_v10, %v742_v42  ;;  %v819_v52 = vsub.f32 %v2813_v3, %v742_v42  ;;  %v1016_v19 = vadd.f32 %v2485_v51, %v2483_v17  ;;  %v2819_v3 = vld [vmem:[#allocation17_spill] sm:$0xff] }
 0x27a   : > { %1617 = vpow2.f32 %v916_v2 }
 0x27b   : > { %v2491_v4 = vpop.eup %1607  ;;  %v918_v5 = vmul.f32 1.442695, %v818_v41  ;;  %v920_v13 = vmul.f32 1.442695, %v819_v52  ;;  %1017 = vadd.xlane.f32.xlu0 %v1016_v19  ;;  %v2820_v19 = vld [vmem:[#allocation18_spill] sm:$0xff] }
 0x27c   : > { %2814 = vst [vmem:[#allocation13_spill] sm:$0xff] %v2491_v4  ;;  %v2493_v33 = vpop.eup %1609  ;;  %v745_v62 = vpop.xlane.xlu1 %744 }
 0x27d   : > { %2815 = vst [vmem:[#allocation14_spill] sm:$0xff] %v2493_v33  ;;  %1619 = vpow2.f32 %v918_v5  ;;  %v820_v25 = vsub.f32 %v2816_v34, %v745_v62  ;;  %v821_v56 = vsub.f32 %v2817_v7, %v745_v62  ;;  %v1019_v16 = vadd.f32 %v2493_v33, %v2491_v4 }
 0x27e   : > { %1621 = vpow2.f32 %v920_v13 }
 0x27f   : > { %v2499_v38 = vpop.eup %1611  ;;  %v922_v2 = vmul.f32 1.442695, %v820_v25  ;;  %v924_v42 = vmul.f32 1.442695, %v821_v56  ;;  %1020 = vadd.xlane.f32.xlu1 %v1019_v16  ;;  %v2822_v25 = vld [vmem:[#allocation19_spill] sm:$0xff]  ;;  %v2823_v16 = vld [vmem:[#allocation20_spill] sm:$0xff] }
 0x280   : > { %2818 = vst [vmem:[#allocation15_spill] sm:$0xff] %v2499_v38  ;;  %v2501_v10 = vpop.eup %1613  ;;  %v748_v41 = vpop.xlane.xlu0 %747 }
 0x281   : > { %1623 = vpow2.f32 %v922_v2  ;;  %v822_v52 = vsub.f32 %v2819_v3, %v748_v41  ;;  %v823_v5 = vsub.f32 %v2820_v19, %v748_v41  ;;  %v1022_v62 = vadd.f32 %v2501_v10, %v2499_v38  ;;  %v2827_v38 = vld [vmem:[#allocation23_spill] sm:$0xff] }
 0x282   : > { %1625 = vpow2.f32 %v924_v42  ;;  %v751_v34 = vpop.xlane.xlu1 %750 }
 0x283   : > { %v2507_v7 = vpop.eup %1615  ;;  %v926_v13 = vmul.f32 1.442695, %v822_v52  ;;  %v928_v17 = vmul.f32 1.442695, %v823_v5  ;;  %v824_v56 = vsub.f32 %v2822_v25, %v751_v34  ;;  %v825_v4 = vsub.f32 %v2823_v16, %v751_v34  ;;  %1023 = vadd.xlane.f32.xlu0 %v1022_v62  ;;  %v2825_v5 = vld [vmem:[#allocation21_spill] sm:$0xff]  ;;  %v2826_v62 = vld [vmem:[#allocation22_spill] sm:$0xff] }
 0x284   : > { %2821 = vst [vmem:[#allocation16_spill] sm:$0xff] %v2507_v7  ;;  %v2511_v33 = vpop.eup %1617 }
 0x285   : > { %2824 = vst [vmem:[#allocation17_spill] sm:$0xff] %v2511_v33  ;;  %1627 = vpow2.f32 %v926_v13  ;;  %v930_v2 = vmul.f32 1.442695, %v824_v56  ;;  %v932_v3 = vmul.f32 1.442695, %v825_v4  ;;  %v1025_v41 = vadd.f32 %v2511_v33, %v2507_v7 }
 0x286   : > { %1629 = vpow2.f32 %v928_v17 }
 0x287   : > { %v2515_v42 = vpop.eup %1619  ;;  %1631 = vpow2.f32 %v930_v2  ;;  %1026 = vadd.xlane.f32.xlu1 %v1025_v41  ;;  %v2828_v2 = vld [vmem:[#allocation24_spill] sm:$0xff] }
 0x288   : > { %v2517_v52 = vpop.eup %1621  ;;  %1633 = vpow2.f32 %v932_v3  ;;  %v754_v19 = vpop.xlane.xlu0 %753 }
 0x289   : > { %v826_v34 = vsub.f32 %v2825_v5, %v754_v19  ;;  %v827_v25 = vsub.f32 %v2826_v62, %v754_v19  ;;  %v1028_v13 = vadd.f32 %v2517_v52, %v2515_v42 }
 0x28a   : > { %v757_v4 = vpop.xlane.xlu1 %756 }
 0x28b   : > { %v2523_v56 = vpop.eup %1623  ;;  %v934_v16 = vmul.f32 1.442695, %v826_v34  ;;  %v936_v17 = vmul.f32 1.442695, %v827_v25  ;;  %v828_v7 = vsub.f32 %v2827_v38, %v757_v4  ;;  %v829_v41 = vsub.f32 %v2828_v2, %v757_v4  ;;  %1029 = vadd.xlane.f32.xlu0 %v1028_v13 }
 0x28c   : > { %v2527_v33 = vpop.eup %1625 }
 0x28d   : > { %1635 = vpow2.f32 %v934_v16  ;;  %v938_v3 = vmul.f32 1.442695, %v828_v7  ;;  %v940_v5 = vmul.f32 1.442695, %v829_v41  ;;  %v1031_v19 = vadd.f32 %v2527_v33, %v2523_v56 }
 0x28e   : > { %1637 = vpow2.f32 %v936_v17 }
 0x28f   : > { %v2531_v62 = vpop.eup %1627  ;;  %1639 = vpow2.f32 %v938_v3  ;;  %1032 = vadd.xlane.f32.xlu1 %v1031_v19 }
 0x290   : > { %2829 = vst [vmem:[#allocation18_spill] sm:$0xff] %v2531_v62  ;;  %v2533_v34 = vpop.eup %1629  ;;  %1641 = vpow2.f32 %v940_v5 }
 0x291   : > { %2830 = vst [vmem:[#allocation19_spill] sm:$0xff] %v2533_v34  ;;  %v2535_v38 = vpop.eup %1631  ;;  %v1034_v25 = vadd.f32 %v2533_v34, %v2531_v62 }
 0x292   : > { %2831 = vst [vmem:[#allocation20_spill] sm:$0xff] %v2535_v38  ;;  %v2539_v13 = vpop.eup %1633 }
 0x293   : > { %2832 = vst [vmem:[#allocation21_spill] sm:$0xff] %v2539_v13  ;;  %1035 = vadd.xlane.f32.xlu0 %v1034_v25  ;;  %v1037_v7 = vadd.f32 %v2539_v13, %v2535_v38 }
 0x295   : > { %1038 = vadd.xlane.f32.xlu1 %v1037_v7 }
 0x297   : > { %v2543_v4 = vpop.eup %1635 }
 0x298   : > { %2833 = vst [vmem:[#allocation22_spill] sm:$0xff] %v2543_v4  ;;  %v2545_v16 = vpop.eup %1637 }
 0x299   : > { %2834 = vst [vmem:[#allocation23_spill] sm:$0xff] %v2545_v16  ;;  %v2547_v17 = vpop.eup %1639  ;;  %v1040_v2 = vadd.f32 %v2545_v16, %v2543_v4 }
 0x29a   : > { %2835 = vst [vmem:[#allocation24_spill] sm:$0xff] %v2547_v17  ;;  %v2551_v41 = vpop.eup %1641 }
 0x29b   : > { %2836 = vst [vmem:[#allocation25_spill] sm:$0xff] %v2551_v41  ;;  %1041 = vadd.xlane.f32.xlu0 %v1040_v2  ;;  %v1043_v3 = vadd.f32 %v2551_v41, %v2547_v17 }
 0x29d   : > { %1044 = vadd.xlane.f32.xlu1 %v1043_v3 }
 0x2d0   : > { %v976_v5 = vpop.xlane.xlu0 %975 }
 0x2d1   : > { %1643 = vrcp.f32 %v976_v5 }
 0x2d4   : > { %v979_v19 = vpop.xlane.xlu1 %978  ;;  %v760_v25 = vpop.xlane.xlu0 %759 }
 0x2d5   : > { %1645 = vrcp.f32 %v979_v19  ;;  %v830_v7 = vsub.f32 %v2291_v59, %v760_v25  ;;  %v831_v62 = vsub.f32 %v2293_v61, %v760_v25 }
 0x2d7   : > { %v942_v38 = vmul.f32 1.442695, %v830_v7  ;;  %v944_v13 = vmul.f32 1.442695, %v831_v62 }
 0x2d8   : > { %v763_v34 = vpop.xlane.xlu1 %762  ;;  %v982_v4 = vpop.xlane.xlu0 %981 }
 0x2d9   : > { %1647 = vpow2.f32 %v942_v38  ;;  %v832_v2 = vsub.f32 %v2295_v0, %v763_v34  ;;  %v833_v16 = vsub.f32 %v2299_v6, %v763_v34 }
 0x2da   : > { %1649 = vpow2.f32 %v944_v13 }
 0x2db   : > { %v946_v3 = vmul.f32 1.442695, %v832_v2  ;;  %v948_v17 = vmul.f32 1.442695, %v833_v16  ;;  %1651 = vrcp.f32 %v982_v4  ;;  %v1644_v19 = vpop.eup %1643 }
 0x2dc   : > { %v985_v5 = vpop.xlane.xlu1 %984  ;;  %v766_v41 = vpop.xlane.xlu0 %765  ;;  %v1103_v6 = vmul.f32 %v1644_v19, %v2349_v28  ;;  %v1102_v13 = vmul.f32 %v1644_v19, %v2347_v36 }
 0x2dd   : > { %1653 = vpow2.f32 %v946_v3  ;;  %v834_v59 = vsub.f32 %v2303_v12, %v766_v41  ;;  %v835_v61 = vsub.f32 %v2305_v15, %v766_v41 }
 0x2de   : > { %1655 = vpow2.f32 %v948_v17 }
 0x2df   : > { %v1646_v62 = vpop.eup %1645  ;;  %1657 = vrcp.f32 %v985_v5  ;;  %v950_v38 = vmul.f32 1.442695, %v834_v59  ;;  %v952_v25 = vmul.f32 1.442695, %v835_v61 }
 0x2e0   : > { %v769_v0 = vpop.xlane.xlu1 %768  ;;  %v988_v7 = vpop.xlane.xlu0 %987  ;;  %v1105_v34 = vmul.f32 %v1646_v62, %v2357_v23  ;;  %v1104_v4 = vmul.f32 %v1646_v62, %v2355_v40 }
 0x2e1   : > { %1659 = vpow2.f32 %v950_v38  ;;  %v836_v12 = vsub.f32 %v2307_v18, %v769_v0  ;;  %v837_v15 = vsub.f32 %v2311_v24, %v769_v0 }
 0x2e2   : > { %1661 = vpow2.f32 %v952_v25  ;;  %v1167_v16 = vpack.c.bf16 %v1105_v34, %v1103_v6  ;;  %v1166_v17 = vpack.c.bf16 %v1104_v4, %v1102_v13 }
 0x2e3   : > { %v2567_v41 = vpop.eup %1647  ;;  %v954_v2 = vmul.f32 1.442695, %v836_v12  ;;  %v956_v3 = vmul.f32 1.442695, %v837_v15  ;;  %1663 = vrcp.f32 %v988_v7 }
 0x2e4   : > { %v2569_v28 = vpop.eup %1649  ;;  %v991_v23 = vpop.xlane.xlu1 %990  ;;  %1210 = vmatprep.subr.bf16.mxu1 %v1167_v16 }
 0x2e5   : > { %v772_v36 = vpop.xlane.xlu0 %771  ;;  %v1652_v5 = vpop.eup %1651  ;;  %1665 = vpow2.f32 %v954_v2  ;;  %1211 = vmatpush1.bf16.xpose.msra.mxu1 %v1166_v17  ;;  %v1046_v24 = vadd.f32 %v2569_v28, %v2567_v41 }
 0x2e6   : > { %v838_v40 = vsub.f32 %v2315_v31, %v772_v36  ;;  %v839_v18 = vsub.f32 %v2317_v37, %v772_v36  ;;  %1667 = vpow2.f32 %v956_v3  ;;  %v1107_v0 = vmul.f32 %v1652_v5, %v2368_v35 }
 0x2e7   : > { %v2575_v19 = vpop.eup %1653  ;;  %1669 = vrcp.f32 %v991_v23  ;;  %1047 = vadd.xlane.f32.xlu0 %v1046_v24  ;;  %v1106_v13 = vmul.f32 %v1652_v5, %v2363_v45 }
 0x2e8   : > { %v958_v59 = vmul.f32 1.442695, %v838_v40  ;;  %v960_v61 = vmul.f32 1.442695, %v839_v18  ;;  %v2577_v62 = vpop.eup %1655  ;;  %v775_v38 = vpop.xlane.xlu1 %774 }
 0x2e9   : > { %v994_v25 = vpop.xlane.xlu0 %993  ;;  %v1658_v31 = vpop.eup %1657  ;;  %v840_v37 = vsub.f32 %v2319_v49, %v775_v38  ;;  %v841_v7 = vsub.f32 %v2323_v9, %v775_v38  ;;  %v1049_v6 = vadd.f32 %v2577_v62, %v2575_v19 }
 0x2ea   : > { %1671 = vpow2.f32 %v958_v59  ;;  %v1109_v34 = vmul.f32 %v1658_v31, %v2379_v39  ;;  %v1108_v4 = vmul.f32 %v1658_v31, %v2374_v26 }
 0x2eb   : > { %1673 = vpow2.f32 %v960_v61  ;;  %v2587_v12 = vpop.eup %1659  ;;  %v962_v15 = vmul.f32 1.442695, %v840_v37  ;;  %v964_v35 = vmul.f32 1.442695, %v841_v7  ;;  %1050 = vadd.xlane.f32.xlu1 %v1049_v6 }
 0x2ec   : > { %v2589_v16 = vpop.eup %1661  ;;  %1675 = vrcp.f32 %v994_v25  ;;  %v997_v49 = vpop.xlane.xlu1 %996  ;;  %v1169_v9 = vpack.c.bf16 %v1109_v34, %v1107_v0  ;;  %v1168_v2 = vpack.c.bf16 %v1108_v4, %v1106_v13 }
 0x2ed   : > { %v778_v17 = vpop.xlane.xlu0 %777  ;;  %v1664_v3 = vpop.eup %1663  ;;  %1677 = vpow2.f32 %v962_v15  ;;  %v1052_v26 = vadd.f32 %v2589_v16, %v2587_v12 }
 0x2ee   : > { %v842_v39 = vsub.f32 %v2327_v21, %v778_v17  ;;  %v843_v45 = vsub.f32 %v2329_v53, %v778_v17  ;;  %1679 = vpow2.f32 %v964_v35  ;;  %1212 = vmatprep.subr.bf16.mxu1 %v1169_v9  ;;  %v1111_v24 = vmul.f32 %v1664_v3, %v2390_v44 }
 0x2ef   : > { %v2595_v23 = vpop.eup %1665  ;;  %1681 = vrcp.f32 %v997_v49  ;;  %1213 = vmatpush1.bf16.xpose.msra.mxu1 %v1168_v2  ;;  %1053 = vadd.xlane.f32.xlu0 %v1052_v26  ;;  %v1110_v0 = vmul.f32 %v1664_v3, %v2385_v22 }
 0x2f0   : > { %v966_v36 = vmul.f32 1.442695, %v842_v39  ;;  %v968_v5 = vmul.f32 1.442695, %v843_v45  ;;  %v2597_v40 = vpop.eup %1667  ;;  %v781_v18 = vpop.xlane.xlu1 %780 }
 0x2f1   : > { %v1670_v21 = vpop.eup %1669  ;;  %v844_v53 = vsub.f32 %v2331_v47, %v781_v18  ;;  %v845_v59 = vsub.f32 %v2335_v43, %v781_v18  ;;  %v1000_v61 = vpop.xlane.xlu0 %999  ;;  %v1055_v38 = vadd.f32 %v2597_v40, %v2595_v23 }
 0x2f2   : > { %1683 = vpow2.f32 %v966_v36  ;;  %v1113_v25 = vmul.f32 %v1670_v21, %v2403_v29  ;;  %v1112_v31 = vmul.f32 %v1670_v21, %v2396_v30 }
 0x2f3   : > { %1685 = vpow2.f32 %v968_v5  ;;  %v970_v44 = vmul.f32 1.442695, %v844_v53  ;;  %v972_v7 = vmul.f32 1.442695, %v845_v59  ;;  %1056 = vadd.xlane.f32.xlu1 %v1055_v38 }
 0x2f4   : > { %v2607_v37 = vpop.eup %1671  ;;  %1687 = vrcp.f32 %v1000_v61  ;;  %v1003_v43 = vpop.xlane.xlu1 %1002  ;;  %v1171_v47 = vpack.c.bf16 %v1113_v25, %v1111_v24  ;;  %v1170_v34 = vpack.c.bf16 %v1112_v31, %v1110_v0 }
 0x2f5   : > { %v2609_v6 = vpop.eup %1673  ;;  %1689 = vpow2.f32 %v970_v44 }
 0x2f6   : > { %v1058_v13 = vadd.f32 %v2609_v6, %v2607_v37  ;;  %v1676_v29 = vpop.eup %1675  ;;  %1691 = vpow2.f32 %v972_v7  ;;  %1214 = vmatprep.subr.bf16.mxu1 %v1171_v47 }
 0x2f7   : > { %v2613_v22 = vpop.eup %1677  ;;  %1693 = vrcp.f32 %v1003_v43  ;;  %1215 = vmatpush1.bf16.xpose.msra.mxu1 %v1170_v34  ;;  %v1115_v49 = vmul.f32 %v1676_v29, %v2412_v58  ;;  %v1114_v17 = vmul.f32 %v1676_v29, %v2407_v50 }
 0x2f8   : > { %1059 = vadd.xlane.f32.xlu0 %v1058_v13  ;;  %v2615_v30 = vpop.eup %1679  ;;  %v1006_v4 = vpop.xlane.xlu0 %1005 }
 0x2f9   : > { %v1682_v15 = vpop.eup %1681  ;;  %v1061_v35 = vadd.f32 %v2615_v30, %v2613_v22  ;;  %1695 = vrcp.f32 %v1006_v4 }
 0x2fa   : > { %v1117_v9 = vmul.f32 %v1682_v15, %v2423_v32  ;;  %v1116_v2 = vmul.f32 %v1682_v15, %v2418_v27 }
 0x2fb   : > { %1062 = vadd.xlane.f32.xlu1 %v1061_v35 }
 0x2fc   : > { %v2623_v3 = vpop.eup %1683  ;;  %v1009_v45 = vpop.xlane.xlu1 %1008  ;;  %v1173_v26 = vpack.c.bf16 %v1117_v9, %v1115_v49  ;;  %v1172_v36 = vpack.c.bf16 %v1116_v2, %v1114_v17 }
 0x2fd   : > { %v2625_v39 = vpop.eup %1685  ;;  %1697 = vrcp.f32 %v1009_v45 }
 0x2fe   : > { %v1064_v5 = vadd.f32 %v2625_v39, %v2623_v3  ;;  %v1688_v58 = vpop.eup %1687  ;;  %1216 = vmatprep.subr.bf16.mxu1 %v1173_v26  ;;  %v2837_v26 = vld [vmem:[#allocation14_spill] sm:$0xff] }
 0x2ff   : > { %v2629_v32 = vpop.eup %1689  ;;  %1217 = vmatpush1.bf16.xpose.msra.mxu1 %v1172_v36  ;;  %v1119_v21 = vmul.f32 %v1688_v58, %v2434_v57  ;;  %v1118_v59 = vmul.f32 %v1688_v58, %v2429_v48  ;;  %v2838_v36 = vld [vmem:[#allocation13_spill] sm:$0xff] }
 0x300   : > { %1065 = vadd.xlane.f32.xlu0 %v1064_v5  ;;  %v2631_v50 = vpop.eup %1691  ;;  %v1012_v27 = vpop.xlane.xlu0 %1011  ;;  %v2839_v5 = vld [vmem:[#allocation12_spill] sm:$0xff] }
 0x301   : > { %v1694_v18 = vpop.eup %1693  ;;  %v1067_v24 = vadd.f32 %v2631_v50, %v2629_v32  ;;  %1699 = vrcp.f32 %v1012_v27 }
 0x302   : > { %v1121_v53 = vmul.f32 %v1694_v18, %v2442_v60  ;;  %v1120_v61 = vmul.f32 %v1694_v18, %v2436_v20 }
 0x303   : > { %1068 = vadd.xlane.f32.xlu1 %v1067_v24  ;;  %v1696_v31 = vpop.eup %1695 }
 0x304   : > { %v1015_v38 = vpop.xlane.xlu1 %1014  ;;  %v1175_v25 = vpack.c.bf16 %v1121_v53, %v1119_v21  ;;  %v1174_v0 = vpack.c.bf16 %v1120_v61, %v1118_v59  ;;  %v1123_v43 = vmul.f32 %v1696_v31, %v2453_v63  ;;  %v1122_v48 = vmul.f32 %v1696_v31, %v2451_v54  ;;  %v2841_v61 = vld [vmem:[#allocation16_spill] sm:$0xff] }
 0x305   : > { %1701 = vrcp.f32 %v1015_v38  ;;  %v1546_v31 = vld [vmem:[%s2101_s30 + $0x4] ss:$8 sps:$4 sm:$0xff]  }
 0x306   : > { %1218 = vmatprep.subr.bf16.mxu1 %v1175_v25  ;;  %v2842_v25 = vld [vmem:[#allocation15_spill] sm:$0xff]  ;;  %1242 = vmatprep.mubr.bf16.mxu1 %v1546_v31 }
 0x307   : > { %v1698_v44 = vpop.eup %1697  ;;  %1219 = vmatpush1.bf16.xpose.msra.mxu1 %v1174_v0 }
 0x308   : > { %v1018_v7 = vpop.xlane.xlu0 %1017  ;;  %v1125_v57 = vmul.f32 %v1698_v44, %v2461_v1  ;;  %v1124_v60 = vmul.f32 %v1698_v44, %v2459_v8 }
 0x309   : > { %1703 = vrcp.f32 %v1018_v7 }
 0x30a   : > { %v1177_v20 = vpack.c.bf16 %v1125_v57, %v1123_v43  ;;  %v1176_v47 = vpack.c.bf16 %v1124_v60, %v1122_v48 }
 0x30b   : > { %v1700_v13 = vpop.eup %1699 }
 0x30c   : > { %v1021_v34 = vpop.xlane.xlu1 %1020  ;;  %1220 = vmatprep.subr.bf16.mxu1 %v1177_v20  ;;  %v1127_v15 = vmul.f32 %v1700_v13, %v2469_v55  ;;  %v1126_v8 = vmul.f32 %v1700_v13, %v2467_v11 }
 0x30d   : > { %1705 = vrcp.f32 %v1021_v34 }
 0x30f   : > { %v1702_v29 = vpop.eup %1701  ;;  %1221 = vmatpush1.bf16.xpose.msra.mxu1 %v1176_v47 }
 0x310   : > { %v1024_v4 = vpop.xlane.xlu0 %1023  ;;  %v1129_v63 = vmul.f32 %v1702_v29, %v2477_v46  ;;  %v1128_v1 = vmul.f32 %v1702_v29, %v2475_v14 }
 0x311   : > { %1707 = vrcp.f32 %v1024_v4 }
 0x312   : > { %v1179_v35 = vpack.c.bf16 %v1129_v63, %v1127_v15  ;;  %v1178_v54 = vpack.c.bf16 %v1128_v1, %v1126_v8  ;;  %v2843_v1 = vld [vmem:[#allocation19_spill] sm:$0xff] }
 0x313   : > { %v1704_v9 = vpop.eup %1703 }
 0x314   : > { %v1027_v49 = vpop.xlane.xlu1 %1026  ;;  %1222 = vmatprep.subr.bf16.mxu1 %v1179_v35  ;;  %v1131_v45 = vmul.f32 %v1704_v9, %v2485_v51  ;;  %v1130_v14 = vmul.f32 %v1704_v9, %v2839_v5  ;;  %v2840_v51 = vld [vmem:[#allocation17_spill] sm:$0xff]  ;;  %v2846_v9 = vld [vmem:[#allocation18_spill] sm:$0xff]  ;;  %v2849_v5 = vld [vmem:[#allocation24_spill] sm:$0xff] }
 0x315   : > { %1709 = vrcp.f32 %v1027_v49  ;;  %v2844_v35 = vld [vmem:[#allocation21_spill] sm:$0xff]  ;;  %v2845_v49 = vld [vmem:[#allocation20_spill] sm:$0xff] }
 0x317   : > { %v1706_v17 = vpop.eup %1705  ;;  %1223 = vmatpush1.bf16.xpose.msra.mxu1 %v1178_v54 }
 0x318   : > { %v1030_v2 = vpop.xlane.xlu0 %1029  ;;  %v1133_v55 = vmul.f32 %v1706_v17, %v2837_v26  ;;  %v1132_v46 = vmul.f32 %v1706_v17, %v2838_v36 }
 0x319   : > { %1711 = vrcp.f32 %v1030_v2 }
 0x31a   : > { %v1181_v11 = vpack.c.bf16 %v1133_v55, %v1131_v45  ;;  %v1180_v58 = vpack.c.bf16 %v1132_v46, %v1130_v14  ;;  %v2847_v45 = vld [vmem:[#allocation23_spill] sm:$0xff]  ;;  %v2848_v55 = vld [vmem:[#allocation25_spill] sm:$0xff] }
 0x31b   : > { %v1708_v18 = vpop.eup %1707 }
 0x31c   : > { %v1033_v27 = vpop.xlane.xlu1 %1032  ;;  %1224 = vmatprep.subr.bf16.mxu1 %v1181_v11  ;;  %v1135_v53 = vmul.f32 %v1708_v18, %v2501_v10  ;;  %v1134_v0 = vmul.f32 %v1708_v18, %v2842_v25  ;;  %v2850_v11 = vld [vmem:[#allocation22_spill] sm:$0xff] }
 0x31d   : > { %1713 = vrcp.f32 %v1033_v27 }
 0x31f   : > { %v1710_v24 = vpop.eup %1709  ;;  %1225 = vmatpush1.bf16.xpose.msra.mxu1 %v1180_v58 }
 0x320   : > { %v1036_v21 = vpop.xlane.xlu0 %1035  ;;  %v1137_v59 = vmul.f32 %v1710_v24, %v2840_v51  ;;  %v1136_v38 = vmul.f32 %v1710_v24, %v2841_v61 }
 0x321   : > { %1715 = vrcp.f32 %v1036_v21 }
 0x322   : > { %v1039_v44 = vpop.xlane.xlu1 %1038  ;;  %v1183_v7 = vpack.c.bf16 %v1137_v59, %v1135_v53  ;;  %v1182_v43 = vpack.c.bf16 %v1136_v38, %v1134_v0 }
 0x323   : > { %1717 = vrcp.f32 %v1039_v44  ;;  %v1712_v57 = vpop.eup %1711 }
 0x324   : > { %1226 = vmatprep.subr.bf16.mxu1 %v1183_v7  ;;  %v1139_v10 = vmul.f32 %v1712_v57, %v2517_v52  ;;  %v1138_v34 = vmul.f32 %v1712_v57, %v2515_v42 }
 0x327   : > { %v1714_v60 = vpop.eup %1713  ;;  %1227 = vmatpush1.bf16.xpose.msra.mxu1 %v1182_v43 }
 0x328   : > { %v1042_v48 = vpop.xlane.xlu0 %1041  ;;  %v1141_v20 = vmul.f32 %v1714_v60, %v2527_v33  ;;  %v1140_v47 = vmul.f32 %v1714_v60, %v2523_v56 }
 0x329   : > { %1719 = vrcp.f32 %v1042_v48 }
 0x32a   : > { %v1045_v13 = vpop.xlane.xlu1 %1044  ;;  %v1185_v29 = vpack.c.bf16 %v1141_v20, %v1139_v10  ;;  %v1184_v15 = vpack.c.bf16 %v1140_v47, %v1138_v34 }
 0x32b   : > { %v1716_v4 = vpop.eup %1715  ;;  %1721 = vrcp.f32 %v1045_v13 }
 0x32c   : > { %1228 = vmatprep.subr.bf16.mxu1 %v1185_v29  ;;  %v1143_v8 = vmul.f32 %v1716_v4, %v2843_v1  ;;  %v1142_v17 = vmul.f32 %v1716_v4, %v2846_v9 }
 0x32d   : > { %v1718_v63 = vpop.eup %1717 }
 0x32e   : > { %v1145_v54 = vmul.f32 %v1718_v63, %v2844_v35  ;;  %v1144_v33 = vmul.f32 %v1718_v63, %v2845_v49 }
 0x32f   : > { %1229 = vmatpush1.bf16.xpose.msra.mxu1 %v1184_v15 }
 0x330   : > { %v1187_v52 = vpack.c.bf16 %v1145_v54, %v1143_v8  ;;  %v1186_v2 = vpack.c.bf16 %v1144_v33, %v1142_v17  ;;  %v1254_v54 = vstv %s1253_s4 }
 0x332   : > { %1230 = vmatprep.subr.bf16.mxu1 %v1187_v52 }
 0x333   : > { %v1720_v56 = vpop.eup %1719 }
 0x334   : > { %v1147_v26 = vmul.f32 %v1720_v56, %v2847_v45  ;;  %v1146_v58 = vmul.f32 %v1720_v56, %v2850_v11  ;;  %v1261_v56 = vld [vmem:[%s2093_s28 + $0x10] sm:$0xff] }
 0x335   : > { %v1722_v42 = vpop.eup %1721 }
 0x336   : > { %v1149_v36 = vmul.f32 %v1722_v42, %v2848_v55  ;;  %v1148_v14 = vmul.f32 %v1722_v42, %v2849_v5 }
 0x337   : > { %1231 = vmatpush1.bf16.xpose.msra.mxu1 %v1186_v2  ;;  %v1262_v2 = vld [vmem:[%s2093_s28 + $0x18] sm:$0xff] }
 0x338   : > { %v1189_v46 = vpack.c.bf16 %v1149_v36, %v1147_v26  ;;  %v1188_v27 = vpack.c.bf16 %v1148_v14, %v1146_v58 }
 0x33a   : > { %1232 = vmatprep.subr.bf16.mxu1 %v1189_v46 }
 0x33f   : > { %1233 = vmatpush1.bf16.xpose.msra.mxu1 %v1188_v27 }
 0x374   : > { %v1048_v18 = vpop.xlane.xlu0 %1047 }
 0x375   : > { %1723 = vrcp.f32 %v1048_v18 }
 0x378   : > { %v1051_v24 = vpop.xlane.xlu1 %1050 }
 0x379   : > { %1725 = vrcp.f32 %v1051_v24 }
 0x37c   : > { %v1054_v21 = vpop.xlane.xlu0 %1053 }
 0x37d   : > { %1727 = vrcp.f32 %v1054_v21 }
 0x37f   : > { %v1724_v51 = vpop.eup %1723 }
 0x380   : > { %v1057_v53 = vpop.xlane.xlu1 %1056  ;;  %v1151_v38 = vmul.f32 %v1724_v51, %v2569_v28  ;;  %v1150_v0 = vmul.f32 %v1724_v51, %v2567_v41 }
 0x381   : > { %1729 = vrcp.f32 %v1057_v53 }
 0x383   : > { %v1726_v59 = vpop.eup %1725 }
 0x384   : > { %v1153_v25 = vmul.f32 %v1726_v59, %v2577_v62  ;;  %v1152_v31 = vmul.f32 %v1726_v59, %v2575_v19 }
 0x385   : > { %v1060_v61 = vpop.xlane.xlu0 %1059 }
 0x386   : > { %v1191_v44 = vpack.c.bf16 %v1153_v25, %v1151_v38  ;;  %v1190_v7 = vpack.c.bf16 %v1152_v31, %v1150_v0  ;;  %1731 = vrcp.f32 %v1060_v61 }
 0x387   : > { %v1728_v57 = vpop.eup %1727 }
 0x388   : > { %v1063_v43 = vpop.xlane.xlu1 %1062  ;;  %1234 = vmatprep.subr.bf16.mxu1 %v1191_v44  ;;  %v1155_v10 = vmul.f32 %v1728_v57, %v2589_v16  ;;  %v1154_v62 = vmul.f32 %v1728_v57, %v2587_v12 }
 0x389   : > { %1733 = vrcp.f32 %v1063_v43  ;;  %1235 = vmatpush1.bf16.xpose.msra.mxu1 %v1190_v7 }
 0x38b   : > { %v1730_v60 = vpop.eup %1729 }
 0x38c   : > { %v1157_v28 = vmul.f32 %v1730_v60, %v2597_v40  ;;  %v1156_v41 = vmul.f32 %v1730_v60, %v2595_v23 }
 0x38d   : > { %v1066_v48 = vpop.xlane.xlu0 %1065 }
 0x38e   : > { %v1193_v20 = vpack.c.bf16 %v1157_v28, %v1155_v10  ;;  %v1192_v19 = vpack.c.bf16 %v1156_v41, %v1154_v62  ;;  %1735 = vrcp.f32 %v1066_v48 }
 0x390   : > { %v1069_v47 = vpop.xlane.xlu1 %1068  ;;  %1236 = vmatprep.subr.bf16.mxu1 %v1193_v20  ;;  %v1732_v34 = vpop.eup %1731 }
 0x391   : > { %1737 = vrcp.f32 %v1069_v47  ;;  %1237 = vmatpush1.bf16.xpose.msra.mxu1 %v1192_v19  ;;  %v1159_v29 = vmul.f32 %v1732_v34, %v2609_v6  ;;  %v1158_v16 = vmul.f32 %v1732_v34, %v2607_v37 }
 0x393   : > { %v1734_v13 = vpop.eup %1733 }
 0x394   : > { %v1161_v4 = vmul.f32 %v1734_v13, %v2615_v30  ;;  %v1160_v12 = vmul.f32 %v1734_v13, %v2613_v22  ;;  %v1544_v22 = vld [vmem:[%s2101_s30] ss:$8 sps:$4 sm:$0xff]  }
 0x396   : > { %v1195_v40 = vpack.c.bf16 %v1161_v4, %v1159_v29  ;;  %v1194_v23 = vpack.c.bf16 %v1160_v12, %v1158_v16 }
 0x398   : > { %1238 = vmatprep.subr.bf16.mxu1 %v1195_v40  ;;  %v1736_v15 = vpop.eup %1735 }
 0x399   : > { %1239 = vmatpush1.bf16.xpose.msra.mxu1 %v1194_v23  ;;  %v1163_v1 = vmul.f32 %v1736_v15, %v2625_v39  ;;  %v1162_v6 = vmul.f32 %v1736_v15, %v2623_v3  ;;  %v1259_v39 = vld [vmem:[%s2093_s28] sm:$0xff] }
 0x39b   : > { %v1738_v63 = vpop.eup %1737 }
 0x39c   : > { %v1165_v8 = vmul.f32 %v1738_v63, %v2631_v50  ;;  %v1164_v37 = vmul.f32 %v1738_v63, %v2629_v32  ;;  %v1260_v50 = vld [vmem:[%s2093_s28 + $0x8] sm:$0xff]  ;;  %s1799_s28 = scalar_lea.vmem %s2692_s10, 512 }
 0x39d   : > { %p1800_p3 = scmp.ne.s32.totalorder %s2692_s10, %s1799_s28  ;;  %p1807_p12 = scmp.lt.s32.totalorder %s1805_s12, %s1799_s28 }
 0x39e   : > { %v1197_v30 = vpack.c.bf16 %v1165_v8, %v1163_v1  ;;  %v1196_v35 = vpack.c.bf16 %v1164_v37, %v1162_v6 }
 0x39f   : > { %p1801_p13 = pnand %p1800_p3, %p2851_p11  ;;  %p1808_p9 = por %p1807_p12, %p1806_p10 }
 0x3a0   : > { %1240 = vmatprep.subr.bf16.mxu1 %v1197_v30 }
 0x3a1   : > { %1241 = vmatpush1.bf16.xpose.msra.mxu1 %v1196_v35  ;;  %p1802_p7 = pneg %p1801_p13 }
 0x3a3   : > { %p1809_p1 = pnand %p1808_p9, %p1802_p7 }
 0x3a8   : > { %1243 = vmatmul.mubr.bf16.vlgmr.msra.gmra.mrb[0].mxu1 %v1544_v22 }
 0x47b   : > { %v1244_v52 = vpop.f32.mrb[0].mxu1 }
 0x47c   : > { %v1255_v49 = vmul.f32 %v1254_v54, %v1244_v52  ;;  %v1246_v3 = vpop.f32.mrb[1].mxu1 }
 0x47d   : > { %v1256_v32 = vmul.f32 %v1254_v54, %v1246_v3  ;;  %v1248_v33 = vpop.f32.mrb[2].mxu1 }
 0x47e   : > { %v1263_v9 = vadd.f32 %v1259_v39, %v1255_v49  ;;  %v1257_v17 = vmul.f32 %v1254_v54, %v1248_v33  ;;  %v1250_v42 = vpop.f32.mrb[3].mxu1 }
 0x47f   : > { %v1264_v45 = vadd.f32 %v1260_v50, %v1256_v32  ;;  %v1258_v26 = vmul.f32 %v1254_v54, %v1250_v42 }
 0x480   : > { %1267 = vst [vmem:[%s338_s11] sm:$0xff] %v1263_v9  ;;  %v1265_v55 = vadd.f32 %v1261_v56, %v1257_v17 }
 0x481   : > { %1268 = vst [vmem:[%s338_s11 + $0x8] sm:$0xff] %v1264_v45  ;;  %v1266_v36 = vadd.f32 %v1262_v2, %v1258_v26 }
 0x482   : > { %1269 = vst [vmem:[%s338_s11 + $0x10] sm:$0xff] %v1265_v55 }
 0x483   : > { %1270 = vst [vmem:[%s338_s11 + $0x18] sm:$0xff] %v1266_v36 }
 0x484   : > { %1812 = shalt.err (!%p1809_p1)
}
 0x485   : > { %s1813_s14 = scalar_lea.hbm %s2697_s13, 512  ;;  %s1817_s17 = scalar_lea.hbm %s2751_s5, 1024 }
 0x486   : > { %p1814_p6 = scmp.ne.s32.totalorder %s2697_s13, %s1813_s14  ;;  %p1818_p4 = scmp.lt.u32.totalorder %s2697_s13, %s2751_s5 }
 0x487   : > { %p1819_p8 = scmp.lt.u32.totalorder %s1817_s17, %s1813_s14  ;;  %p1821_p3 = scmp.lt.u32.totalorder %s1813_s14, %s2697_s13 }
 0x488   : > { %p1815_p2 = pnand %p1814_p6, %p2851_p11 }
 0x489   : > { %p1820_p0 = por %p1819_p8, %p1818_p4 }
 0x48a   : > { %p1816_p5 = pneg %p1815_p2 }
 0x48b   : > { %p1822_p13 = por %p1821_p3, %p1820_p0 }
 0x48d   : > { %p1823_p7 = pnand %p1822_p13, %p1816_p5 }
 0x48f   : > { %1826 = shalt.err (!%p1823_p7)
}
 0x490   : > { %s1896_s18 = smov 256   ;;  %s1897_s29 = smov 16  }
 0x491   : > { %1473 = dma.vmem_to_hbm [thread:$0]  (%p2851_p11), %s2692_s10, 512, %s2697_s13, %s1272_s23, %s1896_s18, %s1896_s18, %s1897_s29  }
 0x492 PF: > { %s1302_s30 = sand.u32 1, %s1865_s20   ;;  %p2852_p10 = scmp.ne.s32.totalorder %s2784_s9, 0 }
 0x493   : > { %p2853_p12 = scmp.ge.s32.totalorder %s1885_s25, 2  ;;  %s1303_s28 = scalar_lea.sflag [#allocation5], %s1302_s30 }
 0x495   : > { %p1483_p9 = pnand %p2853_p12, %p2852_p10 }
 0x497   : > { %1860 = dma.done.wait (!%p1483_p9), %s1303_s28, 512  }
 0x498   : > { %1862 = vsyncadd (!%p1483_p9), %s1303_s28, 4294966784  ;;  %s25_s25 = sadd.s32 1, %s1885_s25   ;;  %s2854_s20 = smov %s1869_s21 }
 0x499   : > { %p22_p1 = scmp.ge.s32.totalorder %s25_s25, 4   ;;  %s2855_s21 = smov %s1873_s22 }
 0x49a   : > { %s2856_s22 = smov %s1987_s8  ;;  %s2857_s23 = smov %s1881_s24 }
 0x49b   : > { %s2858_s24 = smov %s2860_s27  ;;  %24 = sbr.rel (!%p22_p1) target bundleno = 10 (0xa), region = 104 }
 0x4a2   :  { %1308 = vsyncpa [#allocation4], 1 }
 0x4a3   :  { %1310 = vsyncpa [#allocation4 + $0x1], 1 }
 0x4a4   :  { %1311 = vsyncpa [#allocation7], 1 }
 0x4a5   :  { %1313 = vsyncpa [#allocation7 + $0x1], 1 }
 0x4a6   :  { %1314 = vsyncpa [#allocation5], 1 }
 0x4a7   :  { %1316 = vsyncpa [#allocation5 + $0x1], 1 }

</bundles_post_ra>
